<compile_context>
chip_gen: v6e
topology: v6e:2x2x1
jax: 0.10.0
libtpu: 0.0.40
codegen_flags: <defaults>
</compile_context>

<pallas_src>
import functools
import math

import jax
import jax.numpy as jnp
import numpy as np
from jax import lax
from jax.experimental import pallas as pl
from jax.experimental.pallas import tpu as pltpu

EPS = 1e-5


def _bn_train(y, gamma, beta, inv_denom):
    """PyTorch training-mode BatchNorm forward on a (C, M) slab.

    Batch statistics over the M = N*H*W lane axis, biased (population)
    variance, computed in one pass with two XLU lane reductions.
    """
    mean = jnp.sum(y, axis=1, keepdims=True) * inv_denom           # (C, 1)
    mean_sq = jnp.sum(y * y, axis=1, keepdims=True) * inv_denom    # (C, 1)
    var = mean_sq - mean * mean
    scale = gamma * lax.rsqrt(var + EPS)
    return (y - mean) * scale + beta


def basic_block_kernel(p1_ref, xds_ref, valid_ref, w1t_ref, w2a_ref, wdt_ref,
                       g1_ref, b1_ref, gd_ref, bd_ref, out_ref,
                       *, n, ho, wo, cout):
    # p1_ref   : (9*cin, M)  transposed im2col of the input for conv1
    # xds_ref  : (cin,   M)  stride-2 subsampled input for the 1x1 conv
    # valid_ref: (9,     M)  per-tap lane mask (1.0 where the 3x3 window of
    #                        conv2 stays inside the spatial zero-padding)
    # w1t_ref  : (cout, 9*cin)   conv1 weights, transposed
    # w2a_ref  : (9*cout, cout)  conv2 weights, rows = (tap, c_out), cols = c_in
    # wdt_ref  : (cout, cin)     downsample 1x1 conv weights, transposed
    # g*/b*    : (cout, 1)       BN gamma / beta
    # out_ref  : (cout, M)       lane-dense output slab
    m = n * ho * wo
    inv_denom = 1.0 / float(m)

    # ------------------ conv1: one MXU matmul --------------------------------
    y1 = jnp.dot(w1t_ref[...], p1_ref[...],
                 preferred_element_type=jnp.float32)               # (cout, M)

    # ------------------ bn1 (training-mode batch stats) + relu ---------------
    a1 = _bn_train(y1, g1_ref[...], b1_ref[...], inv_denom)
    a1 = jnp.maximum(a1, 0.0)

    # ------------------ conv2 (3x3, stride 1, padding 1) ---------------------
    # Apply all nine (cout x cout) tap weight matrices in one matmul, then
    # realize each tap's spatial shift as a multiplication by an iota-built
    # 0/1 selection matrix (pure MXU/VPU work, no data-movement ops).
    g = jnp.dot(w2a_ref[...], a1,
                preferred_element_type=jnp.float32)                # (9*cout, M)

    jidx = lax.broadcasted_iota(jnp.int32, (m, m), 0)   # source column j
    lidx = lax.broadcasted_iota(jnp.int32, (m, m), 1)   # destination column l
    diff = jidx - lidx
    valid = valid_ref[...]                                          # (9, M)

    y2 = jnp.zeros((cout, m), jnp.float32)
    for dy in range(3):
        for dx in range(3):
            t = dy * 3 + dx
            s = (dy - 1) * wo + (dx - 1)        # flat-index shift of this tap
            sel = jnp.where(diff == s, 1.0, 0.0)                   # (M, M)
            tap = jnp.dot(g[t * cout:(t + 1) * cout, :], sel,
                          preferred_element_type=jnp.float32)      # (cout, M)
            y2 = y2 + tap * valid[t:t + 1, :]

    # NOTE: the reference module computes self.bn2(x) but discards the result,
    # so bn2 does not affect the returned tensor and is intentionally omitted.
    # TODO(synk): BatchNorm running-stat updates (training side effect) are not
    # modeled; they never affect the forward output.

    # ------------------ downsample branch: 1x1 conv (stride 2) + bn ----------
    yd = jnp.dot(wdt_ref[...], xds_ref[...],
                 preferred_element_type=jnp.float32)               # (cout, M)
    skip = _bn_train(yd, gd_ref[...], bd_ref[...], inv_denom)

    out_ref[...] = y2 + skip


def basic_block_forward(x_nchw, params):
    """BasicBlock forward (first_block=True, downsampling=True). NCHW in/out."""
    w1, w2, wd = params["w1"], params["w2"], params["wd"]           # HWIO
    g1, b1, gd, bd = params["g1"], params["b1"], params["gd"], params["bd"]

    n, cin, h, w = x_nchw.shape
    cout = w1.shape[-1]
    stride = 2
    ho = (h + 2 - 3) // stride + 1
    wo = (w + 2 - 3) // stride + 1
    m = n * ho * wo

    # NCHW -> NHWC (f32), pad spatially for conv1
    x = jnp.transpose(x_nchw, (0, 2, 3, 1)).astype(jnp.float32)
    xp = jnp.pad(x, ((0, 0), (1, 1), (1, 1), (0, 0)))

    # Compact transposed im2col for conv1: (9*cin, M), rows (tap, ci)-major,
    # columns = flattened (n, oy, ox).  Only ~2.25x the input (stride 2) and a
    # single XLA fusion; per-tile tap extraction would move in-kernel at scale.
    taps = [xp[:, dy:dy + (ho - 1) * stride + 1:stride,
               dx:dx + (wo - 1) * stride + 1:stride, :]
            for dy in range(3) for dx in range(3)]                  # (n,ho,wo,cin)
    p1 = jnp.stack(taps, axis=0)                                    # (9,n,ho,wo,cin)
    p1 = jnp.transpose(p1, (0, 4, 1, 2, 3)).reshape(9 * cin, m)     # (9*cin, M)

    # stride-2 subsample for the 1x1 downsample conv: (cin, M)
    xds = jnp.transpose(x[:, ::stride, ::stride, :], (3, 0, 1, 2)).reshape(cin, m)

    # Weights re-laid out for the (channels-on-sublane, spatial-on-lane) slabs.
    w1t = jnp.transpose(w1.reshape(9 * cin, cout))                  # (cout, 9*cin)
    w2a = jnp.transpose(w2.reshape(9, cout, cout), (0, 2, 1)).reshape(9 * cout, cout)
    wdt = jnp.transpose(wd.reshape(cin, cout))                      # (cout, cin)

    # Per-tap lane-validity masks for conv2's zero padding (static constants).
    lane = np.arange(m)
    oy = (lane // wo) % ho
    ox = lane % wo
    valid = np.zeros((9, m), np.float32)
    for t in range(9):
        dy, dx = divmod(t, 3)
        ok = ((oy + dy - 1 >= 0) & (oy + dy - 1 <= ho - 1) &
              (ox + dx - 1 >= 0) & (ox + dx - 1 <= wo - 1))
        valid[t] = ok.astype(np.float32)
    valid = jnp.asarray(valid)

    kernel = functools.partial(basic_block_kernel,
                               n=n, ho=ho, wo=wo, cout=cout)
    out2d = pl.pallas_call(
        kernel,
        out_shape=jax.ShapeDtypeStruct((cout, m), jnp.float32),
        in_specs=[pl.BlockSpec(memory_space=pltpu.MemorySpace.VMEM)] * 10,
        out_specs=pl.BlockSpec(memory_space=pltpu.MemorySpace.VMEM),
    )(p1, xds, valid, w1t, w2a, wdt, g1, b1, gd, bd)

    # (cout, n*ho*wo) -> NCHW
    return jnp.transpose(out2d.reshape(cout, n, ho, wo), (1, 0, 2, 3))


def init_params(key, cin, cout):
    """'xavier' init from the module: conv ~ N(0, sqrt(2/(k*k*cout))), BN=(1,0)."""
    k1, k2, k3 = jax.random.split(key, 3)
    std3 = math.sqrt(2.0 / (3 * 3 * cout))
    stdd = math.sqrt(2.0 / (1 * 1 * cout))
    return {
        "w1": std3 * jax.random.normal(k1, (3, 3, cin, cout), jnp.float32),   # HWIO
        "w2": std3 * jax.random.normal(k2, (3, 3, cout, cout), jnp.float32),  # HWIO
        "wd": stdd * jax.random.normal(k3, (1, 1, cin, cout), jnp.float32),   # HWIO
        "g1": jnp.ones((cout, 1), jnp.float32),
        "b1": jnp.zeros((cout, 1), jnp.float32),
        "gd": jnp.ones((cout, 1), jnp.float32),
        "bd": jnp.zeros((cout, 1), jnp.float32),
    }


def reference_forward(x_nchw, params):
    """Pure-JAX reference matching the PyTorch forward (for validation)."""
    dn = ("NHWC", "HWIO", "NHWC")
    hp = lax.Precision.HIGHEST
    x = jnp.transpose(x_nchw, (0, 2, 3, 1)).astype(jnp.float32)

    def bn(y, g, b):
        mm = y.mean(axis=(0, 1, 2), keepdims=True)
        v = ((y - mm) ** 2).mean(axis=(0, 1, 2), keepdims=True)
        return (y - mm) * lax.rsqrt(v + EPS) * g.reshape(1, 1, 1, -1) \
            + b.reshape(1, 1, 1, -1)

    y1 = lax.conv_general_dilated(x, params["w1"], (2, 2), ((1, 1), (1, 1)),
                                  dimension_numbers=dn, precision=hp)
    a1 = jnp.maximum(bn(y1, params["g1"], params["b1"]), 0.0)
    y2 = lax.conv_general_dilated(a1, params["w2"], (1, 1), ((1, 1), (1, 1)),
                                  dimension_numbers=dn, precision=hp)
    # bn2 result discarded in the reference module.
    yd = lax.conv_general_dilated(x, params["wd"], (2, 2), ((0, 0), (0, 0)),
                                  dimension_numbers=dn, precision=hp)
    out = y2 + bn(yd, params["gd"], params["bd"])
    return jnp.transpose(out, (0, 3, 1, 2))


if __name__ == "__main__":
    key = jax.random.PRNGKey(0)
    kx, kp = jax.random.split(key)

    n, cin, h, w = 2, 4, 16, 16          # small NCHW input
    cout = cin * 2                        # first_block=True

    x = jax.random.normal(kx, (n, cin, h, w), jnp.float32)
    params = init_params(kp, cin, cout)

    out = basic_block_forward(x, params)
    out = jax.block_until_ready(out)

    ref = reference_forward(x, params)
    assert out.shape == (n, cout, h // 2, w // 2), out.shape
    assert jnp.allclose(out, ref, atol=1e-3, rtol=1e-3), \
        float(jnp.max(jnp.abs(out - ref)))

    print("KERNEL_OK")
</pallas_src>

<mosaic_0001>
module attributes {stable_mosaic.version = 11 : i64} {
  func.func @basic_block_kernel(%arg0: memref<36x128xf32, #tpu.memory_space<vmem>>, %arg1: memref<4x128xf32, #tpu.memory_space<vmem>>, %arg2: memref<9x128xf32, #tpu.memory_space<vmem>>, %arg3: memref<8x36xf32, #tpu.memory_space<vmem>>, %arg4: memref<72x8xf32, #tpu.memory_space<vmem>>, %arg5: memref<8x4xf32, #tpu.memory_space<vmem>>, %arg6: memref<8x1xf32, #tpu.memory_space<vmem>>, %arg7: memref<8x1xf32, #tpu.memory_space<vmem>>, %arg8: memref<8x1xf32, #tpu.memory_space<vmem>>, %arg9: memref<8x1xf32, #tpu.memory_space<vmem>>, %arg10: memref<8x128xf32, #tpu.memory_space<vmem>>) attributes {dimension_semantics = [], scalar_prefetch = 0 : i64, scratch_operands = 0 : i64, tpu.core_type = #tpu.core_type<tc>} {
    %c0 = arith.constant 0 : index
    %c0_0 = arith.constant 0 : index
    %0 = vector.load %arg3[%c0, %c0_0] : memref<8x36xf32, #tpu.memory_space<vmem>>, vector<8x36xf32>
    %c0_1 = arith.constant 0 : index
    %c0_2 = arith.constant 0 : index
    %1 = vector.load %arg0[%c0_1, %c0_2] : memref<36x128xf32, #tpu.memory_space<vmem>>, vector<36x128xf32>
    %cst = arith.constant dense<0.000000e+00> : vector<8x128xf32>
    %2 = tpu.matmul %0, %1, %cst {dimension_numbers = #tpu.dot_dimension_numbers<[1], [0], [0], [1], [0, 0, 1, 1], [], []>} : vector<8x36xf32>, vector<36x128xf32>, vector<8x128xf32> -> vector<8x128xf32>
    %c0_3 = arith.constant 0 : index
    %c0_4 = arith.constant 0 : index
    %3 = vector.load %arg6[%c0_3, %c0_4] : memref<8x1xf32, #tpu.memory_space<vmem>>, vector<8x1xf32>
    %c0_5 = arith.constant 0 : index
    %c0_6 = arith.constant 0 : index
    %4 = vector.load %arg7[%c0_5, %c0_6] : memref<8x1xf32, #tpu.memory_space<vmem>>, vector<8x1xf32>
    %cst_7 = arith.constant dense<0.000000e+00> : vector<8xf32>
    %5 = vector.multi_reduction <add>, %2, %cst_7 [1] : vector<8x128xf32> to vector<8xf32>
    %6 = vector.shape_cast %5 : vector<8xf32> to vector<8x1xf32>
    %cst_8 = arith.constant 7.812500e-03 : f32
    %7 = vector.broadcast %cst_8 : f32 to vector<8x1xf32>
    %8 = arith.mulf %6, %7 : vector<8x1xf32>
    %9 = arith.mulf %2, %2 : vector<8x128xf32>
    %cst_9 = arith.constant dense<0.000000e+00> : vector<8xf32>
    %10 = vector.multi_reduction <add>, %9, %cst_9 [1] : vector<8x128xf32> to vector<8xf32>
    %11 = vector.shape_cast %10 : vector<8xf32> to vector<8x1xf32>
    %cst_10 = arith.constant 7.812500e-03 : f32
    %12 = vector.broadcast %cst_10 : f32 to vector<8x1xf32>
    %13 = arith.mulf %11, %12 : vector<8x1xf32>
    %14 = arith.mulf %8, %8 : vector<8x1xf32>
    %15 = arith.subf %13, %14 : vector<8x1xf32>
    %cst_11 = arith.constant 9.99999974E-6 : f32
    %16 = vector.broadcast %cst_11 : f32 to vector<8x1xf32>
    %17 = arith.addf %15, %16 : vector<8x1xf32>
    %18 = math.rsqrt %17 : vector<8x1xf32>
    %19 = arith.mulf %3, %18 : vector<8x1xf32>
    %20 = vector.broadcast %8 : vector<8x1xf32> to vector<8x128xf32>
    %21 = arith.subf %2, %20 : vector<8x128xf32>
    %22 = vector.broadcast %19 : vector<8x1xf32> to vector<8x128xf32>
    %23 = arith.mulf %21, %22 : vector<8x128xf32>
    %24 = vector.broadcast %4 : vector<8x1xf32> to vector<8x128xf32>
    %25 = arith.addf %23, %24 : vector<8x128xf32>
    %cst_12 = arith.constant 0.000000e+00 : f32
    %26 = vector.broadcast %cst_12 : f32 to vector<8x128xf32>
    %27 = arith.maximumf %25, %26 : vector<8x128xf32>
    %c0_13 = arith.constant 0 : index
    %c0_14 = arith.constant 0 : index
    %28 = vector.load %arg4[%c0_13, %c0_14] : memref<72x8xf32, #tpu.memory_space<vmem>>, vector<72x8xf32>
    %cst_15 = arith.constant dense<0.000000e+00> : vector<72x128xf32>
    %29 = tpu.matmul %28, %27, %cst_15 {dimension_numbers = #tpu.dot_dimension_numbers<[1], [0], [0], [1], [0, 0, 1, 1], [], []>} : vector<72x8xf32>, vector<8x128xf32>, vector<72x128xf32> -> vector<72x128xf32>
    %30 = tpu.iota {dimensions = array<i32: 0>} : vector<128x128xi32>
    %31 = tpu.iota {dimensions = array<i32: 1>} : vector<128x128xi32>
    %32 = arith.subi %30, %31 : vector<128x128xi32>
    %c0_16 = arith.constant 0 : index
    %c0_17 = arith.constant 0 : index
    %33 = vector.load %arg2[%c0_16, %c0_17] : memref<9x128xf32, #tpu.memory_space<vmem>>, vector<9x128xf32>
    %cst_18 = arith.constant 0.000000e+00 : f32
    %34 = vector.broadcast %cst_18 : f32 to vector<8x128xf32>
    %c-9_i32 = arith.constant -9 : i32
    %35 = vector.broadcast %c-9_i32 : i32 to vector<128x128xi32>
    %36 = arith.cmpi eq, %32, %35 : vector<128x128xi32>
    %cst_19 = arith.constant 1.000000e+00 : f32
    %cst_20 = arith.constant 0.000000e+00 : f32
    %37 = vector.broadcast %cst_19 : f32 to vector<128x128xf32>
    %38 = vector.broadcast %cst_20 : f32 to vector<128x128xf32>
    %39 = arith.select %36, %37, %38 : vector<128x128xi1>, vector<128x128xf32>
    %40 = vector.extract_strided_slice %29 {offsets = [0, 0], sizes = [8, 128], strides = [1, 1]} : vector<72x128xf32> to vector<8x128xf32>
    %cst_21 = arith.constant dense<0.000000e+00> : vector<8x128xf32>
    %41 = tpu.matmul %40, %39, %cst_21 {dimension_numbers = #tpu.dot_dimension_numbers<[1], [0], [0], [1], [0, 0, 1, 1], [], []>} : vector<8x128xf32>, vector<128x128xf32>, vector<8x128xf32> -> vector<8x128xf32>
    %42 = vector.extract_strided_slice %33 {offsets = [0, 0], sizes = [1, 128], strides = [1, 1]} : vector<9x128xf32> to vector<1x128xf32>
    %43 = vector.broadcast %42 : vector<1x128xf32> to vector<8x128xf32>
    %44 = arith.mulf %41, %43 : vector<8x128xf32>
    %45 = arith.addf %34, %44 : vector<8x128xf32>
    %c-8_i32 = arith.constant -8 : i32
    %46 = vector.broadcast %c-8_i32 : i32 to vector<128x128xi32>
    %47 = arith.cmpi eq, %32, %46 : vector<128x128xi32>
    %cst_22 = arith.constant 1.000000e+00 : f32
    %cst_23 = arith.constant 0.000000e+00 : f32
    %48 = vector.broadcast %cst_22 : f32 to vector<128x128xf32>
    %49 = vector.broadcast %cst_23 : f32 to vector<128x128xf32>
    %50 = arith.select %47, %48, %49 : vector<128x128xi1>, vector<128x128xf32>
    %51 = vector.extract_strided_slice %29 {offsets = [8, 0], sizes = [8, 128], strides = [1, 1]} : vector<72x128xf32> to vector<8x128xf32>
    %cst_24 = arith.constant dense<0.000000e+00> : vector<8x128xf32>
    %52 = tpu.matmul %51, %50, %cst_24 {dimension_numbers = #tpu.dot_dimension_numbers<[1], [0], [0], [1], [0, 0, 1, 1], [], []>} : vector<8x128xf32>, vector<128x128xf32>, vector<8x128xf32> -> vector<8x128xf32>
    %53 = vector.extract_strided_slice %33 {offsets = [1, 0], sizes = [1, 128], strides = [1, 1]} : vector<9x128xf32> to vector<1x128xf32>
    %54 = vector.broadcast %53 : vector<1x128xf32> to vector<8x128xf32>
    %55 = arith.mulf %52, %54 : vector<8x128xf32>
    %56 = arith.addf %45, %55 : vector<8x128xf32>
    %c-7_i32 = arith.constant -7 : i32
    %57 = vector.broadcast %c-7_i32 : i32 to vector<128x128xi32>
    %58 = arith.cmpi eq, %32, %57 : vector<128x128xi32>
    %cst_25 = arith.constant 1.000000e+00 : f32
    %cst_26 = arith.constant 0.000000e+00 : f32
    %59 = vector.broadcast %cst_25 : f32 to vector<128x128xf32>
    %60 = vector.broadcast %cst_26 : f32 to vector<128x128xf32>
    %61 = arith.select %58, %59, %60 : vector<128x128xi1>, vector<128x128xf32>
    %62 = vector.extract_strided_slice %29 {offsets = [16, 0], sizes = [8, 128], strides = [1, 1]} : vector<72x128xf32> to vector<8x128xf32>
    %cst_27 = arith.constant dense<0.000000e+00> : vector<8x128xf32>
    %63 = tpu.matmul %62, %61, %cst_27 {dimension_numbers = #tpu.dot_dimension_numbers<[1], [0], [0], [1], [0, 0, 1, 1], [], []>} : vector<8x128xf32>, vector<128x128xf32>, vector<8x128xf32> -> vector<8x128xf32>
    %64 = vector.extract_strided_slice %33 {offsets = [2, 0], sizes = [1, 128], strides = [1, 1]} : vector<9x128xf32> to vector<1x128xf32>
    %65 = vector.broadcast %64 : vector<1x128xf32> to vector<8x128xf32>
    %66 = arith.mulf %63, %65 : vector<8x128xf32>
    %67 = arith.addf %56, %66 : vector<8x128xf32>
    %c-1_i32 = arith.constant -1 : i32
    %68 = vector.broadcast %c-1_i32 : i32 to vector<128x128xi32>
    %69 = arith.cmpi eq, %32, %68 : vector<128x128xi32>
    %cst_28 = arith.constant 1.000000e+00 : f32
    %cst_29 = arith.constant 0.000000e+00 : f32
    %70 = vector.broadcast %cst_28 : f32 to vector<128x128xf32>
    %71 = vector.broadcast %cst_29 : f32 to vector<128x128xf32>
    %72 = arith.select %69, %70, %71 : vector<128x128xi1>, vector<128x128xf32>
    %73 = vector.extract_strided_slice %29 {offsets = [24, 0], sizes = [8, 128], strides = [1, 1]} : vector<72x128xf32> to vector<8x128xf32>
    %cst_30 = arith.constant dense<0.000000e+00> : vector<8x128xf32>
    %74 = tpu.matmul %73, %72, %cst_30 {dimension_numbers = #tpu.dot_dimension_numbers<[1], [0], [0], [1], [0, 0, 1, 1], [], []>} : vector<8x128xf32>, vector<128x128xf32>, vector<8x128xf32> -> vector<8x128xf32>
    %75 = vector.extract_strided_slice %33 {offsets = [3, 0], sizes = [1, 128], strides = [1, 1]} : vector<9x128xf32> to vector<1x128xf32>
    %76 = vector.broadcast %75 : vector<1x128xf32> to vector<8x128xf32>
    %77 = arith.mulf %74, %76 : vector<8x128xf32>
    %78 = arith.addf %67, %77 : vector<8x128xf32>
    %c0_i32 = arith.constant 0 : i32
    %79 = vector.broadcast %c0_i32 : i32 to vector<128x128xi32>
    %80 = arith.cmpi eq, %32, %79 : vector<128x128xi32>
    %cst_31 = arith.constant 1.000000e+00 : f32
    %cst_32 = arith.constant 0.000000e+00 : f32
    %81 = vector.broadcast %cst_31 : f32 to vector<128x128xf32>
    %82 = vector.broadcast %cst_32 : f32 to vector<128x128xf32>
    %83 = arith.select %80, %81, %82 : vector<128x128xi1>, vector<128x128xf32>
    %84 = vector.extract_strided_slice %29 {offsets = [32, 0], sizes = [8, 128], strides = [1, 1]} : vector<72x128xf32> to vector<8x128xf32>
    %cst_33 = arith.constant dense<0.000000e+00> : vector<8x128xf32>
    %85 = tpu.matmul %84, %83, %cst_33 {dimension_numbers = #tpu.dot_dimension_numbers<[1], [0], [0], [1], [0, 0, 1, 1], [], []>} : vector<8x128xf32>, vector<128x128xf32>, vector<8x128xf32> -> vector<8x128xf32>
    %86 = vector.extract_strided_slice %33 {offsets = [4, 0], sizes = [1, 128], strides = [1, 1]} : vector<9x128xf32> to vector<1x128xf32>
    %87 = vector.broadcast %86 : vector<1x128xf32> to vector<8x128xf32>
    %88 = arith.mulf %85, %87 : vector<8x128xf32>
    %89 = arith.addf %78, %88 : vector<8x128xf32>
    %c1_i32 = arith.constant 1 : i32
    %90 = vector.broadcast %c1_i32 : i32 to vector<128x128xi32>
    %91 = arith.cmpi eq, %32, %90 : vector<128x128xi32>
    %cst_34 = arith.constant 1.000000e+00 : f32
    %cst_35 = arith.constant 0.000000e+00 : f32
    %92 = vector.broadcast %cst_34 : f32 to vector<128x128xf32>
    %93 = vector.broadcast %cst_35 : f32 to vector<128x128xf32>
    %94 = arith.select %91, %92, %93 : vector<128x128xi1>, vector<128x128xf32>
    %95 = vector.extract_strided_slice %29 {offsets = [40, 0], sizes = [8, 128], strides = [1, 1]} : vector<72x128xf32> to vector<8x128xf32>
    %cst_36 = arith.constant dense<0.000000e+00> : vector<8x128xf32>
    %96 = tpu.matmul %95, %94, %cst_36 {dimension_numbers = #tpu.dot_dimension_numbers<[1], [0], [0], [1], [0, 0, 1, 1], [], []>} : vector<8x128xf32>, vector<128x128xf32>, vector<8x128xf32> -> vector<8x128xf32>
    %97 = vector.extract_strided_slice %33 {offsets = [5, 0], sizes = [1, 128], strides = [1, 1]} : vector<9x128xf32> to vector<1x128xf32>
    %98 = vector.broadcast %97 : vector<1x128xf32> to vector<8x128xf32>
    %99 = arith.mulf %96, %98 : vector<8x128xf32>
    %100 = arith.addf %89, %99 : vector<8x128xf32>
    %c7_i32 = arith.constant 7 : i32
    %101 = vector.broadcast %c7_i32 : i32 to vector<128x128xi32>
    %102 = arith.cmpi eq, %32, %101 : vector<128x128xi32>
    %cst_37 = arith.constant 1.000000e+00 : f32
    %cst_38 = arith.constant 0.000000e+00 : f32
    %103 = vector.broadcast %cst_37 : f32 to vector<128x128xf32>
    %104 = vector.broadcast %cst_38 : f32 to vector<128x128xf32>
    %105 = arith.select %102, %103, %104 : vector<128x128xi1>, vector<128x128xf32>
    %106 = vector.extract_strided_slice %29 {offsets = [48, 0], sizes = [8, 128], strides = [1, 1]} : vector<72x128xf32> to vector<8x128xf32>
    %cst_39 = arith.constant dense<0.000000e+00> : vector<8x128xf32>
    %107 = tpu.matmul %106, %105, %cst_39 {dimension_numbers = #tpu.dot_dimension_numbers<[1], [0], [0], [1], [0, 0, 1, 1], [], []>} : vector<8x128xf32>, vector<128x128xf32>, vector<8x128xf32> -> vector<8x128xf32>
    %108 = vector.extract_strided_slice %33 {offsets = [6, 0], sizes = [1, 128], strides = [1, 1]} : vector<9x128xf32> to vector<1x128xf32>
    %109 = vector.broadcast %108 : vector<1x128xf32> to vector<8x128xf32>
    %110 = arith.mulf %107, %109 : vector<8x128xf32>
    %111 = arith.addf %100, %110 : vector<8x128xf32>
    %c8_i32 = arith.constant 8 : i32
    %112 = vector.broadcast %c8_i32 : i32 to vector<128x128xi32>
    %113 = arith.cmpi eq, %32, %112 : vector<128x128xi32>
    %cst_40 = arith.constant 1.000000e+00 : f32
    %cst_41 = arith.constant 0.000000e+00 : f32
    %114 = vector.broadcast %cst_40 : f32 to vector<128x128xf32>
    %115 = vector.broadcast %cst_41 : f32 to vector<128x128xf32>
    %116 = arith.select %113, %114, %115 : vector<128x128xi1>, vector<128x128xf32>
    %117 = vector.extract_strided_slice %29 {offsets = [56, 0], sizes = [8, 128], strides = [1, 1]} : vector<72x128xf32> to vector<8x128xf32>
    %cst_42 = arith.constant dense<0.000000e+00> : vector<8x128xf32>
    %118 = tpu.matmul %117, %116, %cst_42 {dimension_numbers = #tpu.dot_dimension_numbers<[1], [0], [0], [1], [0, 0, 1, 1], [], []>} : vector<8x128xf32>, vector<128x128xf32>, vector<8x128xf32> -> vector<8x128xf32>
    %119 = vector.extract_strided_slice %33 {offsets = [7, 0], sizes = [1, 128], strides = [1, 1]} : vector<9x128xf32> to vector<1x128xf32>
    %120 = vector.broadcast %119 : vector<1x128xf32> to vector<8x128xf32>
    %121 = arith.mulf %118, %120 : vector<8x128xf32>
    %122 = arith.addf %111, %121 : vector<8x128xf32>
    %c9_i32 = arith.constant 9 : i32
    %123 = vector.broadcast %c9_i32 : i32 to vector<128x128xi32>
    %124 = arith.cmpi eq, %32, %123 : vector<128x128xi32>
    %cst_43 = arith.constant 1.000000e+00 : f32
    %cst_44 = arith.constant 0.000000e+00 : f32
    %125 = vector.broadcast %cst_43 : f32 to vector<128x128xf32>
    %126 = vector.broadcast %cst_44 : f32 to vector<128x128xf32>
    %127 = arith.select %124, %125, %126 : vector<128x128xi1>, vector<128x128xf32>
    %128 = vector.extract_strided_slice %29 {offsets = [64, 0], sizes = [8, 128], strides = [1, 1]} : vector<72x128xf32> to vector<8x128xf32>
    %cst_45 = arith.constant dense<0.000000e+00> : vector<8x128xf32>
    %129 = tpu.matmul %128, %127, %cst_45 {dimension_numbers = #tpu.dot_dimension_numbers<[1], [0], [0], [1], [0, 0, 1, 1], [], []>} : vector<8x128xf32>, vector<128x128xf32>, vector<8x128xf32> -> vector<8x128xf32>
    %130 = vector.extract_strided_slice %33 {offsets = [8, 0], sizes = [1, 128], strides = [1, 1]} : vector<9x128xf32> to vector<1x128xf32>
    %131 = vector.broadcast %130 : vector<1x128xf32> to vector<8x128xf32>
    %132 = arith.mulf %129, %131 : vector<8x128xf32>
    %133 = arith.addf %122, %132 : vector<8x128xf32>
    %c0_46 = arith.constant 0 : index
    %c0_47 = arith.constant 0 : index
    %134 = vector.load %arg5[%c0_46, %c0_47] : memref<8x4xf32, #tpu.memory_space<vmem>>, vector<8x4xf32>
    %c0_48 = arith.constant 0 : index
    %c0_49 = arith.constant 0 : index
    %135 = vector.load %arg1[%c0_48, %c0_49] : memref<4x128xf32, #tpu.memory_space<vmem>>, vector<4x128xf32>
    %cst_50 = arith.constant dense<0.000000e+00> : vector<8x128xf32>
    %136 = tpu.matmul %134, %135, %cst_50 {dimension_numbers = #tpu.dot_dimension_numbers<[1], [0], [0], [1], [0, 0, 1, 1], [], []>} : vector<8x4xf32>, vector<4x128xf32>, vector<8x128xf32> -> vector<8x128xf32>
    %c0_51 = arith.constant 0 : index
    %c0_52 = arith.constant 0 : index
    %137 = vector.load %arg8[%c0_51, %c0_52] : memref<8x1xf32, #tpu.memory_space<vmem>>, vector<8x1xf32>
    %c0_53 = arith.constant 0 : index
    %c0_54 = arith.constant 0 : index
    %138 = vector.load %arg9[%c0_53, %c0_54] : memref<8x1xf32, #tpu.memory_space<vmem>>, vector<8x1xf32>
    %cst_55 = arith.constant dense<0.000000e+00> : vector<8xf32>
    %139 = vector.multi_reduction <add>, %136, %cst_55 [1] : vector<8x128xf32> to vector<8xf32>
    %140 = vector.shape_cast %139 : vector<8xf32> to vector<8x1xf32>
    %cst_56 = arith.constant 7.812500e-03 : f32
    %141 = vector.broadcast %cst_56 : f32 to vector<8x1xf32>
    %142 = arith.mulf %140, %141 : vector<8x1xf32>
    %143 = arith.mulf %136, %136 : vector<8x128xf32>
    %cst_57 = arith.constant dense<0.000000e+00> : vector<8xf32>
    %144 = vector.multi_reduction <add>, %143, %cst_57 [1] : vector<8x128xf32> to vector<8xf32>
    %145 = vector.shape_cast %144 : vector<8xf32> to vector<8x1xf32>
    %cst_58 = arith.constant 7.812500e-03 : f32
    %146 = vector.broadcast %cst_58 : f32 to vector<8x1xf32>
    %147 = arith.mulf %145, %146 : vector<8x1xf32>
    %148 = arith.mulf %142, %142 : vector<8x1xf32>
    %149 = arith.subf %147, %148 : vector<8x1xf32>
    %cst_59 = arith.constant 9.99999974E-6 : f32
    %150 = vector.broadcast %cst_59 : f32 to vector<8x1xf32>
    %151 = arith.addf %149, %150 : vector<8x1xf32>
    %152 = math.rsqrt %151 : vector<8x1xf32>
    %153 = arith.mulf %137, %152 : vector<8x1xf32>
    %154 = vector.broadcast %142 : vector<8x1xf32> to vector<8x128xf32>
    %155 = arith.subf %136, %154 : vector<8x128xf32>
    %156 = vector.broadcast %153 : vector<8x1xf32> to vector<8x128xf32>
    %157 = arith.mulf %155, %156 : vector<8x128xf32>
    %158 = vector.broadcast %138 : vector<8x1xf32> to vector<8x128xf32>
    %159 = arith.addf %157, %158 : vector<8x128xf32>
    %160 = arith.addf %133, %159 : vector<8x128xf32>
    %c0_60 = arith.constant 0 : index
    %c0_61 = arith.constant 0 : index
    %161 = vector.load %arg10[%c0_60, %c0_61] : memref<8x128xf32, #tpu.memory_space<vmem>>, vector<8x128xf32>
    tpu.vector_store %arg10[%c0_60, %c0_61], %160 {strides = array<i32>} : memref<8x128xf32, #tpu.memory_space<vmem>>, vector<8x128xf32>,
    return
  }
}

</mosaic_0001>

<bundles_post_ra>
// kernel: tpu_custom_call.1
= control target key start
LH: loop header
LB: loop body
LE: loop exit
PB: predicated region body
PF: predicated region fallthrough
CT: control target
= control target key end

     0   :  { %vm46_vm0 = vcmask 1043456   ;;  %v2140_v1 = vmov 0.0   ;;  %vm2141_vm1 = vmmov 0   ;;  %s2862_s0 = inlined_call_operand.vmem [shape: f32[36,128], index: 0, kind: input, shape index: {}]   ;;  %s2863_s1 = inlined_call_operand.vmem [shape: f32[4,128], index: 1, kind: input, shape index: {}]   ;;  %s2864_s2 = inlined_call_operand.vmem [shape: f32[9,128], index: 2, kind: input, shape index: {}]   ;;  %s2865_s3 = inlined_call_operand.vmem [shape: f32[8,36], index: 3, kind: input, shape index: {}]   ;;  %s2866_s4 = inlined_call_operand.vmem [shape: f32[72,8], index: 4, kind: input, shape index: {}]   ;;  %s2867_s5 = inlined_call_operand.vmem [shape: f32[8,4], index: 5, kind: input, shape index: {}]   ;;  %s2868_s6 = inlined_call_operand.vmem [shape: f32[8,1], index: 6, kind: input, shape index: {}]   ;;  %s2869_s7 = inlined_call_operand.vmem [shape: f32[8,1], index: 7, kind: input, shape index: {}]   ;;  %s2870_s8 = inlined_call_operand.vmem [shape: f32[8,1], index: 8, kind: input, shape index: {}]   ;;  %s2871_s9 = inlined_call_operand.vmem [shape: f32[8,1], index: 9, kind: input, shape index: {}]   ;;  %s2872_s10 = inlined_call_operand.hbm [shape: f32[8,128], index: 10, kind: output, shape index: {}]  }
   0x1   :  { %v41_v0 = vld [vmem:[%s2862_s0 + $0x20] sm:$0xf]  ;;  %1749 = vmatprep.subr.mxu0 %v2140_v1  ;;  %v40_v2 = vld [vmem:[%s2862_s0 + $0x18] sm:$0xff]  ;;  %1791 = vmatprep.subr.mxu1 %v2140_v1 }
   0x2   :  { %1750 = vmatpush3.msk.msra.mxu0 %vm46_vm0, %v41_v0  ;;  %1759 = vmatprep.mubr.msk.f32.mxu0 %vm2141_vm1, %v2140_v1 }
   0x3   :  { %15 = vsyncpa [#allocation3], 0  ;;  %1751 = vmatprep.subr.mxu0 %v2140_v1  ;;  %v39_v3 = vld [vmem:[%s2862_s0 + $0x10] sm:$0xff]  ;;  %1821 = vmatprep.mubr.msk.f32.mxu1 %vm2141_vm1, %v2140_v1  ;;  %v38_v4 = vld [vmem:[%s2862_s0 + $0x8] sm:$0xff]  ;;  %vm42_vm2 = vcmask 293888   ;;  %v2142_v10 = vmov 0   ;;  %v295_v22 = vlaneseq }
   0x4   :  { %1752 = vmatpush3.msra.mxu0 %v40_v2  ;;  %v37_v5 = vld [vmem:[%s2862_s0] sm:$0xff]  ;;  %2112 = vset.pattern.permute.xlu1 %v2142_v10  ;;  %v2143_v35 = vmov 1.0   ;;  %v149_v62 = vld [vmem:[%s2866_s4 + $0x8] sm:$0xff]  ;;  %v150_v63 = vld [vmem:[%s2866_s4 + $0x10] sm:$0xff] }
   0x5   :  { %1753 = vmatprep.subr.mxu0 %v2140_v1  ;;  %v36_v6 = vld [vmem:[%s2865_s3] sm:$0xff]  ;;  %2113 = vset.pattern.permute.xlu0 %v2142_v10  ;;  %v2247_v23 = vshrl.u32 %v295_v22, 7  ;;  %v2249_v24 = vand.u32 127, %v295_v22  ;;  %v151_v0 = vld [vmem:[%s2866_s4 + $0x18] sm:$0xff] }
   0x6   :  { %1754 = vmatpush3.msra.mxu0 %v39_v3  ;;  %v120_v18 = vld [vmem:[%s2868_s6] sm:$0xff]  ;;  %v153_v3 = vld [vmem:[%s2866_s4 + $0x28] sm:$0xff] }
   0x7   :  { %1755 = vmatprep.subr.mxu0 %v2140_v1  ;;  %v121_v21 = vld [vmem:[%s2869_s7] sm:$0xff]  ;;  %v310_v25 = vadd.s32 112, %v2247_v23  ;;  %v309_v26 = vadd.s32 104, %v2247_v23  ;;  %v308_v27 = vadd.s32 96, %v2247_v23  ;;  %v307_v28 = vadd.s32 88, %v2247_v23 }
   0x8   :  { %1756 = vmatpush3.msra.mxu0 %v38_v4  ;;  %v306_v32 = vadd.s32 80, %v2247_v23  ;;  %v305_v34 = vadd.s32 72, %v2247_v23  ;;  %v304_v37 = vadd.s32 64, %v2247_v23  ;;  %v303_v39 = vadd.s32 56, %v2247_v23  ;;  %v148_v61 = vld [vmem:[%s2866_s4] sm:$0xff]  ;;  %v154_v4 = vld [vmem:[%s2866_s4 + $0x30] sm:$0xff] }
   0x9   :  { %1757 = vmatprep.subr.mxu0 %v2140_v1  ;;  %v2256_v29 = vsub.s32 %v310_v25, %v2249_v24  ;;  %v2259_v30 = vsub.s32 %v309_v26, %v2249_v24  ;;  %v2262_v31 = vsub.s32 %v308_v27, %v2249_v24  ;;  %v2268_v33 = vsub.s32 %v307_v28, %v2249_v24  ;;  %v152_v2 = vld [vmem:[%s2866_s4 + $0x20] sm:$0xff] }
   0xa   :  { %1758 = vmatpush3.msra.mxu0 %v37_v5  ;;  %v2275_v36 = vsub.s32 %v306_v32, %v2249_v24  ;;  %v2282_v38 = vsub.s32 %v305_v34, %v2249_v24  ;;  %v2289_v40 = vsub.s32 %v304_v37, %v2249_v24  ;;  %v302_v41 = vadd.s32 48, %v2247_v23  ;;  %v155_v5 = vld [vmem:[%s2866_s4 + $0x38] sm:$0xff]  ;;  %v1305_v28 = vld [vmem:[%s2863_s1] sm:$0xf] }
   0xb   :  { %1760 = vmatmul.mubr.msk.f32.vlgmr.msra.gmra.mxu0 %vm42_vm2, %v36_v6  ;;  %1762 = vmatprep.subr.mxu0 %v2140_v1  ;;  %vm346_vm3 = vcmp.eq.s32.totalorder %v2256_v29, 4294967287  ;;  %vm345_vm4 = vcmp.eq.s32.totalorder %v2259_v30, 4294967287  ;;  %vm344_vm5 = vcmp.eq.s32.totalorder %v2262_v31, 4294967287  ;;  %vm343_vm6 = vcmp.eq.s32.totalorder %v2268_v33, 4294967287  ;;  %v156_v6 = vld [vmem:[%s2866_s4 + $0x40] sm:$0xff] }
   0xc   :  { %1764 = vmatprep.mubr.msk.f32.mxu0 %vm2141_vm1, %v2140_v1  ;;  %1792 = vmatpush3.msk.msra.mxu1 %vm346_vm3, %v2143_v35  ;;  %vm342_vm7 = vcmp.eq.s32.totalorder %v2275_v36, 4294967287  ;;  %vm341_vm8 = vcmp.eq.s32.totalorder %v2282_v38, 4294967287  ;;  %v2296_v42 = vsub.s32 %v303_v39, %v2249_v24  ;;  %v301_v43 = vadd.s32 40, %v2247_v23  ;;  %v330_v32 = vld [vmem:[%s2864_s2] sm:$0xff] }
   0xd   :  { %1793 = vmatprep.subr.mxu1 %v2140_v1  ;;  %vm340_vm9 = vcmp.eq.s32.totalorder %v2289_v40, 4294967287  ;;  %v2303_v44 = vsub.s32 %v302_v41, %v2249_v24  ;;  %v300_v45 = vadd.s32 32, %v2247_v23  ;;  %v299_v47 = vadd.s32 24, %v2247_v23 }
   0xe   :  { %1794 = vmatpush3.msk.msra.mxu1 %vm345_vm4, %v2143_v35  ;;  %vm339_vm10 = vcmp.eq.s32.totalorder %v2296_v42, 4294967287  ;;  %v2310_v46 = vsub.s32 %v301_v43, %v2249_v24  ;;  %v298_v49 = vadd.s32 16, %v2247_v23  ;;  %v297_v51 = vadd.s32 8, %v2247_v23 }
   0xf   :  { %1795 = vmatprep.subr.mxu1 %v2140_v1  ;;  %vm338_vm11 = vcmp.eq.s32.totalorder %v2303_v44, 4294967287  ;;  %v2317_v48 = vsub.s32 %v300_v45, %v2249_v24  ;;  %v2324_v50 = vsub.s32 %v299_v47, %v2249_v24  ;;  %v2344_v54 = vsub.s32 %v2247_v23, %v2249_v24 }
  0x10   :  { %1796 = vmatpush3.msk.msra.mxu1 %vm344_vm5, %v2143_v35  ;;  %vm337_vm12 = vcmp.eq.s32.totalorder %v2310_v46, 4294967287  ;;  %v2331_v52 = vsub.s32 %v298_v49, %v2249_v24  ;;  %v2337_v53 = vsub.s32 %v297_v51, %v2249_v24  ;;  %vm157_vm4 = vcmask 64512  }
  0x11   :  { %1797 = vmatprep.subr.mxu1 %v2140_v1  ;;  %vm336_vm13 = vcmp.eq.s32.totalorder %v2317_v48, 4294967287  ;;  %vm335_vm14 = vcmp.eq.s32.totalorder %v2324_v50, 4294967287  ;;  %vm332_vm3 = vcmp.eq.s32.totalorder %v2344_v54, 4294967287  ;;  %vm454_vm5 = vcmp.eq.s32.totalorder %v2256_v29, 4294967288 }
  0x12   :  { %1798 = vmatpush3.msk.msra.mxu1 %vm343_vm6, %v2143_v35  ;;  %vm334_vm15 = vcmp.eq.s32.totalorder %v2331_v52, 4294967287  ;;  %vm333_vm2 = vcmp.eq.s32.totalorder %v2337_v53, 4294967287  ;;  %vm453_vm6 = vcmp.eq.s32.totalorder %v2259_v30, 4294967288  ;;  %v760_v43 = vsub.s32 3, %v2247_v23 }
  0x13   :  { %1799 = vmatprep.subr.mxu1 %v2140_v1 }
  0x14   :  { %1800 = vmatpush3.msk.msra.mxu1 %vm342_vm7, %v2143_v35  ;;  %vm452_vm7 = vcmp.eq.s32.totalorder %v2262_v31, 4294967288  ;;  %v761_v47 = vrot.slane %v330_v32, %v760_v43 }
  0x15   :  { %1801 = vmatprep.subr.mxu1 %v2140_v1 }
  0x16   :  { %1802 = vmatpush3.msk.msra.mxu1 %vm341_vm8, %v2143_v35  ;;  %vm451_vm8 = vcmp.eq.s32.totalorder %v2268_v33, 4294967288 }
  0x17   :  { %1803 = vmatprep.subr.mxu1 %v2140_v1 }
  0x18   :  { %1804 = vmatpush3.msk.msra.mxu1 %vm340_vm9, %v2143_v35  ;;  %vm450_vm9 = vcmp.eq.s32.totalorder %v2275_v36, 4294967288 }
  0x19   :  { %1805 = vmatprep.subr.mxu1 %v2140_v1 }
  0x1a   :  { %1806 = vmatpush3.msk.msra.mxu1 %vm339_vm10, %v2143_v35  ;;  %vm449_vm10 = vcmp.eq.s32.totalorder %v2282_v38, 4294967288 }
  0x1b   :  { %1807 = vmatprep.subr.mxu1 %v2140_v1 }
  0x1c   :  { %1808 = vmatpush3.msk.msra.mxu1 %vm338_vm11, %v2143_v35  ;;  %vm448_vm11 = vcmp.eq.s32.totalorder %v2289_v40, 4294967288 }
  0x1d   :  { %1809 = vmatprep.subr.mxu1 %v2140_v1 }
  0x1e   :  { %1810 = vmatpush3.msk.msra.mxu1 %vm337_vm12, %v2143_v35  ;;  %vm447_vm12 = vcmp.eq.s32.totalorder %v2296_v42, 4294967288 }
  0x1f   :  { %1811 = vmatprep.subr.mxu1 %v2140_v1 }
  0x20   :  { %1812 = vmatpush3.msk.msra.mxu1 %vm336_vm13, %v2143_v35  ;;  %vm446_vm13 = vcmp.eq.s32.totalorder %v2303_v44, 4294967288 }
  0x21   :  { %1813 = vmatprep.subr.mxu1 %v2140_v1 }
  0x22   :  { %1814 = vmatpush3.msk.msra.mxu1 %vm335_vm14, %v2143_v35  ;;  %vm445_vm14 = vcmp.eq.s32.totalorder %v2310_v46, 4294967288 }
  0x23   :  { %1815 = vmatprep.subr.mxu1 %v2140_v1 }
  0x24   :  { %1816 = vmatpush3.msk.msra.mxu1 %vm334_vm15, %v2143_v35  ;;  %vm444_vm15 = vcmp.eq.s32.totalorder %v2317_v48, 4294967288 }
  0x25   :  { %1817 = vmatprep.subr.mxu1 %v2140_v1 }
  0x26   :  { %1818 = vmatpush3.msk.msra.mxu1 %vm333_vm2, %v2143_v35  ;;  %vm443_vm2 = vcmp.eq.s32.totalorder %v2324_v50, 4294967288 }
  0x27   :  { %1819 = vmatprep.subr.mxu1 %v2140_v1 }
  0x28   :  { %1820 = vmatpush3.msk.msra.mxu1 %vm332_vm3, %v2143_v35  ;;  %vm442_vm3 = vcmp.eq.s32.totalorder %v2331_v52, 4294967288 }
  0x29   :  { %1857 = vmatprep.subr.mxu1 %v2140_v1 }
  0xcb   :  { %v2232_v7 = vpop.f32.mrf.mxu0 }
  0xcc   :  { %122 = vadd.xlane.f32.xlu0 %v2232_v7  ;;  %v125_v9 = vmul.f32 %v2232_v7, %v2232_v7 }
  0xcd   :  { %v1761_v8 = vpop.f32.mrf.mxu0 }
  0xd0   :  { %126 = vadd.xlane.f32.xlu0 %v125_v9 }
 0x155   :  { %v123_v11 = vpop.xlane.xlu0 %122 }
 0x156   :  { %v2237_v12 = vmul.f32 0.0078125, %v123_v11 }
 0x158   :  { %v129_v14 = vmul.f32 %v2237_v12, %v2237_v12  ;;  %v134_v56 = vsub.f32 %v2232_v7, %v2237_v12  ;;  %v311_v7 = vadd.s32 120, %v2247_v23 }
 0x159   :  { %v127_v13 = vpop.xlane.xlu0 %126 }
 0x15a   :  { %v128_v15 = vmul.f32 0.0078125, %v127_v13  ;;  %v2460_v8 = vsub.s32 %v311_v7, %v2249_v24 }
 0x15c   :  { %v130_v16 = vsub.f32 %v128_v15, %v129_v14 }
 0x15e   :  { %v131_v17 = vadd.f32 1e-05, %v130_v16 }
 0x160   :  { %2114 = vrsqrt.f32 %v131_v17 }
 0x16d   :  { %v2115_v19 = vpop.eup %2114 }
 0x16e   :  { %v133_v20 = vmul.f32 %v2115_v19, %v120_v18 }
 0x170   :  { %137 = vperm.xlu1 %2112, %v133_v20  }
 0x174   :  { %143 = vperm.xlu1 %2112, %v121_v21  }
 0x1eb   :  { %v138_v55 = vpop.permute.xlu1 %137 }
 0x1ec   :  { %v140_v57 = vmul.f32 %v138_v55, %v134_v56  ;;  %v976_v55 = vsub.s32 5, %v2247_v23 }
 0x1ef   :  { %v144_v58 = vpop.permute.xlu1 %143 }
 0x1f0   :  { %v146_v59 = vadd.f32 %v144_v58, %v140_v57 }
 0x1f2   :  { %v147_v60 = vmax.f32 %v146_v59, 0.0  ;;  %v977_v59 = vrot.slane %v330_v32, %v976_v55 }
 0x1f4   :  { %1763 = vmatpush3.msra.mxu0 %v147_v60 }
 0x1f5   :  { %1765 = vmatmul.mubr.msk.f32.vlgmr.msra.gmra.mxu0 %vm157_vm4, %v148_v61  ;;  %1824 = vmatprep.subr.mxu0 %v2140_v1 }
 0x1f6   :  { %1767 = vmatprep.mubr.msk.f32.mxu0 %vm2141_vm1, %v2140_v1  ;;  %1825 = vmatpush3.msk.msra.mxu0 %vm454_vm5, %v2143_v35  ;;  %vm441_vm5 = vcmp.eq.s32.totalorder %v2337_v53, 4294967288 }
 0x1f7   :  { %1826 = vmatprep.subr.mxu0 %v2140_v1 }
 0x1f8   :  { %1827 = vmatpush3.msk.msra.mxu0 %vm453_vm6, %v2143_v35  ;;  %vm440_vm6 = vcmp.eq.s32.totalorder %v2344_v54, 4294967288 }
 0x1f9   :  { %1768 = vmatmul.mubr.msk.f32.gmra.mxu0 %vm157_vm4, %v149_v62  ;;  %1828 = vmatprep.subr.mxu0 %v2140_v1 }
 0x1fa   :  { %1770 = vmatprep.mubr.msk.f32.mxu0 %vm2141_vm1, %v2140_v1  ;;  %1829 = vmatpush3.msk.msra.mxu0 %vm452_vm7, %v2143_v35  ;;  %vm562_vm7 = vcmp.eq.s32.totalorder %v2256_v29, 4294967289 }
 0x1fb   :  { %1830 = vmatprep.subr.mxu0 %v2140_v1 }
 0x1fc   :  { %1831 = vmatpush3.msk.msra.mxu0 %vm451_vm8, %v2143_v35  ;;  %vm561_vm8 = vcmp.eq.s32.totalorder %v2259_v30, 4294967289 }
 0x1fd   :  { %1771 = vmatmul.mubr.msk.f32.gmra.mxu0 %vm157_vm4, %v150_v63  ;;  %1832 = vmatprep.subr.mxu0 %v2140_v1 }
 0x1fe   :  { %1773 = vmatprep.mubr.msk.f32.mxu0 %vm2141_vm1, %v2140_v1  ;;  %1833 = vmatpush3.msk.msra.mxu0 %vm450_vm9, %v2143_v35  ;;  %vm671_vm9 = vcmp.eq.s32.totalorder %v2460_v8, 4294967295 }
 0x1ff   :  { %1834 = vmatprep.subr.mxu0 %v2140_v1 }
 0x200   :  { %1835 = vmatpush3.msk.msra.mxu0 %vm449_vm10, %v2143_v35  ;;  %vm560_vm10 = vcmp.eq.s32.totalorder %v2262_v31, 4294967289 }
 0x201   :  { %1774 = vmatmul.mubr.msk.f32.gmra.mxu0 %vm157_vm4, %v151_v0  ;;  %1836 = vmatprep.subr.mxu0 %v2140_v1 }
 0x202   :  { %1776 = vmatprep.mubr.msk.f32.mxu0 %vm2141_vm1, %v2140_v1  ;;  %1837 = vmatpush3.msk.msra.mxu0 %vm448_vm11, %v2143_v35  ;;  %vm670_vm11 = vcmp.eq.s32.totalorder %v2256_v29, 4294967295 }
 0x203   :  { %1838 = vmatprep.subr.mxu0 %v2140_v1 }
 0x204   :  { %1839 = vmatpush3.msk.msra.mxu0 %vm447_vm12, %v2143_v35  ;;  %vm559_vm12 = vcmp.eq.s32.totalorder %v2268_v33, 4294967289 }
 0x205   :  { %1777 = vmatmul.mubr.msk.f32.gmra.mxu0 %vm157_vm4, %v152_v2  ;;  %1840 = vmatprep.subr.mxu0 %v2140_v1  ;;  %v1084_v2 = vsub.s32 6, %v2247_v23 }
 0x206   :  { %1779 = vmatprep.mubr.msk.f32.mxu0 %vm2141_vm1, %v2140_v1  ;;  %1841 = vmatpush3.msk.msra.mxu0 %vm446_vm13, %v2143_v35  ;;  %vm669_vm13 = vcmp.eq.s32.totalorder %v2259_v30, 4294967295 }
 0x207   :  { %1842 = vmatprep.subr.mxu0 %v2140_v1 }
 0x208   :  { %1843 = vmatpush3.msk.msra.mxu0 %vm445_vm14, %v2143_v35  ;;  %vm558_vm14 = vcmp.eq.s32.totalorder %v2275_v36, 4294967289 }
 0x209   :  { %1780 = vmatmul.mubr.msk.f32.gmra.mxu0 %vm157_vm4, %v153_v3  ;;  %1844 = vmatprep.subr.mxu0 %v2140_v1  ;;  %v1085_v3 = vrot.slane %v330_v32, %v1084_v2 }
 0x20a   :  { %1782 = vmatprep.mubr.msk.f32.mxu0 %vm2141_vm1, %v2140_v1  ;;  %1845 = vmatpush3.msk.msra.mxu0 %vm444_vm15, %v2143_v35  ;;  %vm668_vm15 = vcmp.eq.s32.totalorder %v2262_v31, 4294967295 }
 0x20b   :  { %1846 = vmatprep.subr.mxu0 %v2140_v1 }
 0x20c   :  { %1847 = vmatpush3.msk.msra.mxu0 %vm443_vm2, %v2143_v35  ;;  %vm557_vm2 = vcmp.eq.s32.totalorder %v2282_v38, 4294967289 }
 0x20d   :  { %1783 = vmatmul.mubr.msk.f32.gmra.mxu0 %vm157_vm4, %v154_v4  ;;  %1848 = vmatprep.subr.mxu0 %v2140_v1  ;;  %v1192_v4 = vsub.s32 7, %v2247_v23 }
 0x20e   :  { %1785 = vmatprep.mubr.msk.f32.mxu0 %vm2141_vm1, %v2140_v1  ;;  %1849 = vmatpush3.msk.msra.mxu0 %vm442_vm3, %v2143_v35  ;;  %vm667_vm3 = vcmp.eq.s32.totalorder %v2268_v33, 4294967295 }
 0x20f   :  { %1850 = vmatprep.subr.mxu0 %v2140_v1 }
 0x210   :  { %1851 = vmatpush3.msk.msra.mxu0 %vm441_vm5, %v2143_v35  ;;  %vm556_vm5 = vcmp.eq.s32.totalorder %v2289_v40, 4294967289 }
 0x211   :  { %1786 = vmatmul.mubr.msk.f32.gmra.mxu0 %vm157_vm4, %v155_v5  ;;  %1852 = vmatprep.subr.mxu0 %v2140_v1 }
 0x212   :  { %1788 = vmatprep.mubr.msk.f32.mxu0 %vm2141_vm1, %v2140_v1  ;;  %1853 = vmatpush3.msk.msra.mxu0 %vm440_vm6, %v2143_v35  ;;  %vm666_vm6 = vcmp.eq.s32.totalorder %v2275_v36, 4294967295 }
 0x213   :  { %1892 = vmatprep.subr.mxu0 %v2140_v1 }
 0x215   :  { %1789 = vmatmul.mubr.msk.f32.gmra.mxu0 %vm157_vm4, %v156_v6  ;;  %vm563_vm4 = vcmp.eq.s32.totalorder %v2460_v8, 4294967289 }
 0x216   :  { %1854 = vmatprep.mubr.msk.f32.mxu0 %vm2141_vm1, %v2140_v1 }
 0x2b5   :  { %v251_v9 = vpop.f32.mrf.mxu0 }
 0x2b6   :  { %1822 = vmatmul.mubr.f32.vlgmr.msra.gmra.mxu1 %v251_v9 }
 0x2b7   :  { %1858 = vmatpush3.msk.msra.mxu1 %vm563_vm4, %v2143_v35  ;;  %v1766_v10 = vpop.f32.mrf.mxu0  ;;  %1889 = vmatprep.mubr.msk.f32.mxu1 %vm2141_vm1, %v2140_v1  ;;  %vm555_vm4 = vcmp.eq.s32.totalorder %v2296_v42, 4294967289 }
 0x2b8   :  { %1859 = vmatprep.subr.mxu1 %v2140_v1 }
 0x2b9   :  { %1860 = vmatpush3.msk.msra.mxu1 %vm562_vm7, %v2143_v35  ;;  %v256_v11 = vpop.f32.mrf.mxu0  ;;  %vm665_vm7 = vcmp.eq.s32.totalorder %v2282_v38, 4294967295 }
 0x2ba   :  { %1861 = vmatprep.subr.mxu1 %v2140_v1  ;;  %1855 = vmatmul.mubr.f32.vlgmr.msra.gmra.mxu0 %v256_v11 }
 0x2bb   :  { %1862 = vmatpush3.msk.msra.mxu1 %vm561_vm8, %v2143_v35  ;;  %1893 = vmatpush3.msk.msra.mxu0 %vm671_vm9, %v2143_v35  ;;  %v1769_v12 = vpop.f32.mrf.mxu0  ;;  %vm554_vm8 = vcmp.eq.s32.totalorder %v2303_v44, 4294967289  ;;  %vm664_vm9 = vcmp.eq.s32.totalorder %v2289_v40, 4294967295 }
 0x2bc   :  { %1863 = vmatprep.subr.mxu1 %v2140_v1  ;;  %1894 = vmatprep.subr.mxu0 %v2140_v1 }
 0x2bd   :  { %1864 = vmatpush3.msk.msra.mxu1 %vm560_vm10, %v2143_v35  ;;  %1895 = vmatpush3.msk.msra.mxu0 %vm670_vm11, %v2143_v35  ;;  %v2482_v13 = vpop.f32.mrf.mxu0  ;;  %vm553_vm10 = vcmp.eq.s32.totalorder %v2310_v46, 4294967289  ;;  %vm663_vm11 = vcmp.eq.s32.totalorder %v2296_v42, 4294967295 }
 0x2be   :  { %1865 = vmatprep.subr.mxu1 %v2140_v1  ;;  %1896 = vmatprep.subr.mxu0 %v2140_v1 }
 0x2bf   :  { %1866 = vmatpush3.msk.msra.mxu1 %vm559_vm12, %v2143_v35  ;;  %1897 = vmatpush3.msk.msra.mxu0 %vm669_vm13, %v2143_v35  ;;  %v1772_v14 = vpop.f32.mrf.mxu0  ;;  %vm552_vm12 = vcmp.eq.s32.totalorder %v2317_v48, 4294967289  ;;  %vm662_vm13 = vcmp.eq.s32.totalorder %v2303_v44, 4294967295 }
 0x2c0   :  { %1867 = vmatprep.subr.mxu1 %v2140_v1  ;;  %1898 = vmatprep.subr.mxu0 %v2140_v1 }
 0x2c1   :  { %1868 = vmatpush3.msk.msra.mxu1 %vm558_vm14, %v2143_v35  ;;  %1899 = vmatpush3.msk.msra.mxu0 %vm668_vm15, %v2143_v35  ;;  %v2496_v15 = vpop.f32.mrf.mxu0  ;;  %vm551_vm14 = vcmp.eq.s32.totalorder %v2324_v50, 4294967289  ;;  %vm661_vm15 = vcmp.eq.s32.totalorder %v2310_v46, 4294967295 }
 0x2c2   :  { %1869 = vmatprep.subr.mxu1 %v2140_v1  ;;  %1900 = vmatprep.subr.mxu0 %v2140_v1 }
 0x2c3   :  { %1870 = vmatpush3.msk.msra.mxu1 %vm557_vm2, %v2143_v35  ;;  %1901 = vmatpush3.msk.msra.mxu0 %vm667_vm3, %v2143_v35  ;;  %v1775_v16 = vpop.f32.mrf.mxu0  ;;  %vm550_vm2 = vcmp.eq.s32.totalorder %v2331_v52, 4294967289  ;;  %vm660_vm3 = vcmp.eq.s32.totalorder %v2317_v48, 4294967295 }
 0x2c4   :  { %1871 = vmatprep.subr.mxu1 %v2140_v1  ;;  %1902 = vmatprep.subr.mxu0 %v2140_v1 }
 0x2c5   :  { %1872 = vmatpush3.msk.msra.mxu1 %vm556_vm5, %v2143_v35  ;;  %1903 = vmatpush3.msk.msra.mxu0 %vm666_vm6, %v2143_v35  ;;  %v2510_v17 = vpop.f32.mrf.mxu0  ;;  %vm549_vm5 = vcmp.eq.s32.totalorder %v2337_v53, 4294967289  ;;  %vm659_vm6 = vcmp.eq.s32.totalorder %v2324_v50, 4294967295 }
 0x2c6   :  { %1873 = vmatprep.subr.mxu1 %v2140_v1  ;;  %1904 = vmatprep.subr.mxu0 %v2140_v1 }
 0x2c7   :  { %1874 = vmatpush3.msk.msra.mxu1 %vm555_vm4, %v2143_v35  ;;  %1905 = vmatpush3.msk.msra.mxu0 %vm665_vm7, %v2143_v35  ;;  %v1778_v18 = vpop.f32.mrf.mxu0  ;;  %vm548_vm4 = vcmp.eq.s32.totalorder %v2344_v54, 4294967289  ;;  %vm658_vm7 = vcmp.eq.s32.totalorder %v2331_v52, 4294967295 }
 0x2c8   :  { %1875 = vmatprep.subr.mxu1 %v2140_v1  ;;  %1906 = vmatprep.subr.mxu0 %v2140_v1 }
 0x2c9   :  { %1876 = vmatpush3.msk.msra.mxu1 %vm554_vm8, %v2143_v35  ;;  %1907 = vmatpush3.msk.msra.mxu0 %vm664_vm9, %v2143_v35  ;;  %v2524_v19 = vpop.f32.mrf.mxu0  ;;  %vm657_vm8 = vcmp.eq.s32.totalorder %v2337_v53, 4294967295  ;;  %vm779_vm9 = vcmp.eq.s32.totalorder %v2460_v8, 0 }
 0x2ca   :  { %1877 = vmatprep.subr.mxu1 %v2140_v1  ;;  %1908 = vmatprep.subr.mxu0 %v2140_v1 }
 0x2cb   :  { %1878 = vmatpush3.msk.msra.mxu1 %vm553_vm10, %v2143_v35  ;;  %1909 = vmatpush3.msk.msra.mxu0 %vm663_vm11, %v2143_v35  ;;  %v1781_v20 = vpop.f32.mrf.mxu0  ;;  %vm656_vm10 = vcmp.eq.s32.totalorder %v2344_v54, 4294967295  ;;  %vm778_vm11 = vcmp.eq.s32.totalorder %v2256_v29, 0 }
 0x2cc   :  { %1879 = vmatprep.subr.mxu1 %v2140_v1  ;;  %1910 = vmatprep.subr.mxu0 %v2140_v1 }
 0x2cd   :  { %1880 = vmatpush3.msk.msra.mxu1 %vm552_vm12, %v2143_v35  ;;  %1911 = vmatpush3.msk.msra.mxu0 %vm662_vm13, %v2143_v35  ;;  %v2538_v21 = vpop.f32.mrf.mxu0  ;;  %vm777_vm12 = vcmp.eq.s32.totalorder %v2259_v30, 0  ;;  %vm887_vm13 = vcmp.eq.s32.totalorder %v2460_v8, 1 }
 0x2ce   :  { %1881 = vmatprep.subr.mxu1 %v2140_v1  ;;  %1912 = vmatprep.subr.mxu0 %v2140_v1 }
 0x2cf   :  { %1882 = vmatpush3.msk.msra.mxu1 %vm551_vm14, %v2143_v35  ;;  %1913 = vmatpush3.msk.msra.mxu0 %vm661_vm15, %v2143_v35  ;;  %v1784_v22 = vpop.f32.mrf.mxu0  ;;  %vm776_vm14 = vcmp.eq.s32.totalorder %v2262_v31, 0  ;;  %vm886_vm15 = vcmp.eq.s32.totalorder %v2256_v29, 1 }
 0x2d0   :  { %1883 = vmatprep.subr.mxu1 %v2140_v1  ;;  %1914 = vmatprep.subr.mxu0 %v2140_v1 }
 0x2d1   :  { %1884 = vmatpush3.msk.msra.mxu1 %vm550_vm2, %v2143_v35  ;;  %1915 = vmatpush3.msk.msra.mxu0 %vm660_vm3, %v2143_v35  ;;  %v2552_v24 = vpop.f32.mrf.mxu0  ;;  %vm775_vm2 = vcmp.eq.s32.totalorder %v2268_v33, 0  ;;  %vm885_vm3 = vcmp.eq.s32.totalorder %v2259_v30, 1 }
 0x2d2   :  { %1885 = vmatprep.subr.mxu1 %v2140_v1  ;;  %1916 = vmatprep.subr.mxu0 %v2140_v1 }
 0x2d3   :  { %1886 = vmatpush3.msk.msra.mxu1 %vm549_vm5, %v2143_v35  ;;  %1917 = vmatpush3.msk.msra.mxu0 %vm659_vm6, %v2143_v35  ;;  %v1787_v25 = vpop.f32.mrf.mxu0  ;;  %vm774_vm5 = vcmp.eq.s32.totalorder %v2275_v36, 0  ;;  %vm884_vm6 = vcmp.eq.s32.totalorder %v2262_v31, 1 }
 0x2d4   :  { %1887 = vmatprep.subr.mxu1 %v2140_v1  ;;  %1918 = vmatprep.subr.mxu0 %v2140_v1 }
 0x2d5   :  { %1888 = vmatpush3.msk.msra.mxu1 %vm548_vm4, %v2143_v35  ;;  %1919 = vmatpush3.msk.msra.mxu0 %vm658_vm7, %v2143_v35  ;;  %v2566_v26 = vpop.f32.mrf.mxu0  ;;  %vm773_vm4 = vcmp.eq.s32.totalorder %v2282_v38, 0  ;;  %vm883_vm7 = vcmp.eq.s32.totalorder %v2268_v33, 1 }
 0x2d6   :  { %1890 = vmatmul.mubr.f32.vlgmr.msra.gmra.mxu1 %v2482_v13  ;;  %1920 = vmatprep.subr.mxu0 %v2140_v1 }
 0x2d7   :  { %1927 = vmatprep.subr.mxu1 %v2140_v1  ;;  %1921 = vmatpush3.msk.msra.mxu0 %vm657_vm8, %v2143_v35  ;;  %v1790_v27 = vpop.f32.mrf.mxu0  ;;  %vm772_vm8 = vcmp.eq.s32.totalorder %v2289_v40, 0 }
 0x2d8   :  { %1928 = vmatpush3.msk.msra.mxu1 %vm779_vm9, %v2143_v35  ;;  %1922 = vmatprep.subr.mxu0 %v2140_v1  ;;  %vm882_vm9 = vcmp.eq.s32.totalorder %v2275_v36, 1 }
 0x2d9   :  { %1929 = vmatprep.subr.mxu1 %v2140_v1  ;;  %1923 = vmatpush3.msk.msra.mxu0 %vm656_vm10, %v2143_v35  ;;  %vm771_vm10 = vcmp.eq.s32.totalorder %v2296_v42, 0 }
 0x2da   :  { %1924 = vmatprep.mubr.msk.f32.mxu0 %vm2141_vm1, %v2140_v1  ;;  %1930 = vmatpush3.msk.msra.mxu1 %vm778_vm11, %v2143_v35  ;;  %vm881_vm11 = vcmp.eq.s32.totalorder %v2282_v38, 1 }
 0x2db   :  { %1925 = vmatmul.mubr.f32.vlgmr.msra.gmra.mxu0 %v2496_v15  ;;  %1931 = vmatprep.subr.mxu1 %v2140_v1 }
 0x2dc   :  { %1962 = vmatprep.subr.mxu0 %v2140_v1  ;;  %1932 = vmatpush3.msk.msra.mxu1 %vm777_vm12, %v2143_v35  ;;  %vm770_vm12 = vcmp.eq.s32.totalorder %v2303_v44, 0 }
 0x2dd   :  { %1963 = vmatpush3.msk.msra.mxu0 %vm887_vm13, %v2143_v35  ;;  %1933 = vmatprep.subr.mxu1 %v2140_v1  ;;  %vm880_vm13 = vcmp.eq.s32.totalorder %v2289_v40, 1 }
 0x2de   :  { %1964 = vmatprep.subr.mxu0 %v2140_v1  ;;  %1934 = vmatpush3.msk.msra.mxu1 %vm776_vm14, %v2143_v35  ;;  %vm769_vm14 = vcmp.eq.s32.totalorder %v2310_v46, 0 }
 0x2df   :  { %1965 = vmatpush3.msk.msra.mxu0 %vm886_vm15, %v2143_v35  ;;  %1935 = vmatprep.subr.mxu1 %v2140_v1  ;;  %vm879_vm15 = vcmp.eq.s32.totalorder %v2296_v42, 1 }
 0x2e0   :  { %1966 = vmatprep.subr.mxu0 %v2140_v1  ;;  %1936 = vmatpush3.msk.msra.mxu1 %vm775_vm2, %v2143_v35  ;;  %vm768_vm2 = vcmp.eq.s32.totalorder %v2317_v48, 0 }
 0x2e1   :  { %1967 = vmatpush3.msk.msra.mxu0 %vm885_vm3, %v2143_v35  ;;  %1937 = vmatprep.subr.mxu1 %v2140_v1  ;;  %vm878_vm3 = vcmp.eq.s32.totalorder %v2303_v44, 1 }
 0x2e2   :  { %1968 = vmatprep.subr.mxu0 %v2140_v1  ;;  %1938 = vmatpush3.msk.msra.mxu1 %vm774_vm5, %v2143_v35  ;;  %vm767_vm5 = vcmp.eq.s32.totalorder %v2324_v50, 0 }
 0x2e3   :  { %1969 = vmatpush3.msk.msra.mxu0 %vm884_vm6, %v2143_v35  ;;  %1939 = vmatprep.subr.mxu1 %v2140_v1  ;;  %vm877_vm6 = vcmp.eq.s32.totalorder %v2310_v46, 1 }
 0x2e4   :  { %1970 = vmatprep.subr.mxu0 %v2140_v1  ;;  %1940 = vmatpush3.msk.msra.mxu1 %vm773_vm4, %v2143_v35  ;;  %vm766_vm4 = vcmp.eq.s32.totalorder %v2331_v52, 0 }
 0x2e5   :  { %1971 = vmatpush3.msk.msra.mxu0 %vm883_vm7, %v2143_v35  ;;  %1941 = vmatprep.subr.mxu1 %v2140_v1  ;;  %vm876_vm7 = vcmp.eq.s32.totalorder %v2317_v48, 1 }
 0x2e6   :  { %1972 = vmatprep.subr.mxu0 %v2140_v1  ;;  %1942 = vmatpush3.msk.msra.mxu1 %vm772_vm8, %v2143_v35  ;;  %vm765_vm8 = vcmp.eq.s32.totalorder %v2337_v53, 0 }
 0x2e7   :  { %1973 = vmatpush3.msk.msra.mxu0 %vm882_vm9, %v2143_v35  ;;  %1943 = vmatprep.subr.mxu1 %v2140_v1  ;;  %vm875_vm9 = vcmp.eq.s32.totalorder %v2324_v50, 1 }
 0x2e8   :  { %1974 = vmatprep.subr.mxu0 %v2140_v1  ;;  %1944 = vmatpush3.msk.msra.mxu1 %vm771_vm10, %v2143_v35  ;;  %vm764_vm10 = vcmp.eq.s32.totalorder %v2344_v54, 0 }
 0x2e9   :  { %1975 = vmatpush3.msk.msra.mxu0 %vm881_vm11, %v2143_v35  ;;  %1945 = vmatprep.subr.mxu1 %v2140_v1  ;;  %vm874_vm11 = vcmp.eq.s32.totalorder %v2331_v52, 1 }
 0x2ea   :  { %1976 = vmatprep.subr.mxu0 %v2140_v1  ;;  %1946 = vmatpush3.msk.msra.mxu1 %vm770_vm12, %v2143_v35  ;;  %vm873_vm12 = vcmp.eq.s32.totalorder %v2337_v53, 1 }
 0x2eb   :  { %1977 = vmatpush3.msk.msra.mxu0 %vm880_vm13, %v2143_v35  ;;  %1947 = vmatprep.subr.mxu1 %v2140_v1  ;;  %vm995_vm13 = vcmp.eq.s32.totalorder %v2460_v8, 7 }
 0x2ec   :  { %1978 = vmatprep.subr.mxu0 %v2140_v1  ;;  %1948 = vmatpush3.msk.msra.mxu1 %vm769_vm14, %v2143_v35  ;;  %vm872_vm14 = vcmp.eq.s32.totalorder %v2344_v54, 1 }
 0x2ed   :  { %1979 = vmatpush3.msk.msra.mxu0 %vm879_vm15, %v2143_v35  ;;  %1949 = vmatprep.subr.mxu1 %v2140_v1  ;;  %vm994_vm15 = vcmp.eq.s32.totalorder %v2256_v29, 7 }
 0x2ee   :  { %1980 = vmatprep.subr.mxu0 %v2140_v1  ;;  %1950 = vmatpush3.msk.msra.mxu1 %vm768_vm2, %v2143_v35  ;;  %vm993_vm2 = vcmp.eq.s32.totalorder %v2259_v30, 7 }
 0x2ef   :  { %1981 = vmatpush3.msk.msra.mxu0 %vm878_vm3, %v2143_v35  ;;  %1951 = vmatprep.subr.mxu1 %v2140_v1  ;;  %vm1103_vm3 = vcmp.eq.s32.totalorder %v2460_v8, 8 }
 0x2f0   :  { %1982 = vmatprep.subr.mxu0 %v2140_v1  ;;  %1952 = vmatpush3.msk.msra.mxu1 %vm767_vm5, %v2143_v35  ;;  %vm992_vm5 = vcmp.eq.s32.totalorder %v2262_v31, 7 }
 0x2f1   :  { %1983 = vmatpush3.msk.msra.mxu0 %vm877_vm6, %v2143_v35  ;;  %1953 = vmatprep.subr.mxu1 %v2140_v1  ;;  %vm1102_vm6 = vcmp.eq.s32.totalorder %v2256_v29, 8 }
 0x2f2   :  { %1984 = vmatprep.subr.mxu0 %v2140_v1  ;;  %1954 = vmatpush3.msk.msra.mxu1 %vm766_vm4, %v2143_v35  ;;  %vm991_vm4 = vcmp.eq.s32.totalorder %v2268_v33, 7 }
 0x2f3   :  { %1985 = vmatpush3.msk.msra.mxu0 %vm876_vm7, %v2143_v35  ;;  %1955 = vmatprep.subr.mxu1 %v2140_v1  ;;  %vm1101_vm7 = vcmp.eq.s32.totalorder %v2259_v30, 8 }
 0x2f4   :  { %1986 = vmatprep.subr.mxu0 %v2140_v1  ;;  %1956 = vmatpush3.msk.msra.mxu1 %vm765_vm8, %v2143_v35  ;;  %vm990_vm8 = vcmp.eq.s32.totalorder %v2275_v36, 7 }
 0x2f5   :  { %1987 = vmatpush3.msk.msra.mxu0 %vm875_vm9, %v2143_v35  ;;  %1957 = vmatprep.subr.mxu1 %v2140_v1  ;;  %vm1100_vm9 = vcmp.eq.s32.totalorder %v2262_v31, 8 }
 0x2f6   :  { %1988 = vmatprep.subr.mxu0 %v2140_v1  ;;  %1958 = vmatpush3.msk.msra.mxu1 %vm764_vm10, %v2143_v35  ;;  %vm989_vm10 = vcmp.eq.s32.totalorder %v2282_v38, 7 }
 0x2f7   :  { %1959 = vmatprep.mubr.msk.f32.mxu1 %vm2141_vm1, %v2140_v1  ;;  %1989 = vmatpush3.msk.msra.mxu0 %vm874_vm11, %v2143_v35  ;;  %vm1099_vm11 = vcmp.eq.s32.totalorder %v2268_v33, 8 }
 0x2f8   :  { %1960 = vmatmul.mubr.f32.vlgmr.msra.gmra.mxu1 %v2510_v17  ;;  %1990 = vmatprep.subr.mxu0 %v2140_v1  ;;  %v1384_v17 = vld [vmem:[%s2871_s9] sm:$0xff] }
 0x2f9   :  { %1997 = vmatprep.subr.mxu1 %v2140_v1  ;;  %1991 = vmatpush3.msk.msra.mxu0 %vm873_vm12, %v2143_v35  ;;  %vm988_vm12 = vcmp.eq.s32.totalorder %v2289_v40, 7 }
 0x2fa   :  { %1998 = vmatpush3.msk.msra.mxu1 %vm995_vm13, %v2143_v35  ;;  %1992 = vmatprep.subr.mxu0 %v2140_v1  ;;  %vm1098_vm13 = vcmp.eq.s32.totalorder %v2275_v36, 8 }
 0x2fb   :  { %1999 = vmatprep.subr.mxu1 %v2140_v1  ;;  %1993 = vmatpush3.msk.msra.mxu0 %vm872_vm14, %v2143_v35  ;;  %vm987_vm14 = vcmp.eq.s32.totalorder %v2296_v42, 7 }
 0x2fc   :  { %1994 = vmatprep.mubr.msk.f32.mxu0 %vm2141_vm1, %v2140_v1  ;;  %2000 = vmatpush3.msk.msra.mxu1 %vm994_vm15, %v2143_v35  ;;  %vm1097_vm15 = vcmp.eq.s32.totalorder %v2282_v38, 8 }
 0x2fd   :  { %1995 = vmatmul.mubr.f32.vlgmr.msra.gmra.mxu0 %v2524_v19  ;;  %2001 = vmatprep.subr.mxu1 %v2140_v1 }
 0x2fe   :  { %2032 = vmatprep.subr.mxu0 %v2140_v1  ;;  %2002 = vmatpush3.msk.msra.mxu1 %vm993_vm2, %v2143_v35  ;;  %vm986_vm2 = vcmp.eq.s32.totalorder %v2303_v44, 7 }
 0x2ff   :  { %2033 = vmatpush3.msk.msra.mxu0 %vm1103_vm3, %v2143_v35  ;;  %2003 = vmatprep.subr.mxu1 %v2140_v1  ;;  %vm1096_vm3 = vcmp.eq.s32.totalorder %v2289_v40, 8 }
 0x300   :  { %2034 = vmatprep.subr.mxu0 %v2140_v1  ;;  %2004 = vmatpush3.msk.msra.mxu1 %vm992_vm5, %v2143_v35  ;;  %vm985_vm5 = vcmp.eq.s32.totalorder %v2310_v46, 7 }
 0x301   :  { %2035 = vmatpush3.msk.msra.mxu0 %vm1102_vm6, %v2143_v35  ;;  %2005 = vmatprep.subr.mxu1 %v2140_v1  ;;  %vm1095_vm6 = vcmp.eq.s32.totalorder %v2296_v42, 8 }
 0x302   :  { %2036 = vmatprep.subr.mxu0 %v2140_v1  ;;  %2006 = vmatpush3.msk.msra.mxu1 %vm991_vm4, %v2143_v35  ;;  %vm984_vm4 = vcmp.eq.s32.totalorder %v2317_v48, 7 }
 0x303   :  { %2037 = vmatpush3.msk.msra.mxu0 %vm1101_vm7, %v2143_v35  ;;  %2007 = vmatprep.subr.mxu1 %v2140_v1  ;;  %vm1094_vm7 = vcmp.eq.s32.totalorder %v2303_v44, 8 }
 0x304   :  { %2038 = vmatprep.subr.mxu0 %v2140_v1  ;;  %2008 = vmatpush3.msk.msra.mxu1 %vm990_vm8, %v2143_v35  ;;  %vm983_vm8 = vcmp.eq.s32.totalorder %v2324_v50, 7 }
 0x305   :  { %2039 = vmatpush3.msk.msra.mxu0 %vm1100_vm9, %v2143_v35  ;;  %2009 = vmatprep.subr.mxu1 %v2140_v1  ;;  %vm1093_vm9 = vcmp.eq.s32.totalorder %v2310_v46, 8 }
 0x306   :  { %2040 = vmatprep.subr.mxu0 %v2140_v1  ;;  %2010 = vmatpush3.msk.msra.mxu1 %vm989_vm10, %v2143_v35  ;;  %vm982_vm10 = vcmp.eq.s32.totalorder %v2331_v52, 7 }
 0x307   :  { %2041 = vmatpush3.msk.msra.mxu0 %vm1099_vm11, %v2143_v35  ;;  %2011 = vmatprep.subr.mxu1 %v2140_v1  ;;  %vm1092_vm11 = vcmp.eq.s32.totalorder %v2317_v48, 8 }
 0x308   :  { %2042 = vmatprep.subr.mxu0 %v2140_v1  ;;  %2012 = vmatpush3.msk.msra.mxu1 %vm988_vm12, %v2143_v35  ;;  %vm981_vm12 = vcmp.eq.s32.totalorder %v2337_v53, 7 }
 0x309   :  { %2043 = vmatpush3.msk.msra.mxu0 %vm1098_vm13, %v2143_v35  ;;  %2013 = vmatprep.subr.mxu1 %v2140_v1  ;;  %vm1091_vm13 = vcmp.eq.s32.totalorder %v2324_v50, 8 }
 0x30a   :  { %2044 = vmatprep.subr.mxu0 %v2140_v1  ;;  %2014 = vmatpush3.msk.msra.mxu1 %vm987_vm14, %v2143_v35  ;;  %vm980_vm14 = vcmp.eq.s32.totalorder %v2344_v54, 7 }
 0x30b   :  { %2045 = vmatpush3.msk.msra.mxu0 %vm1097_vm15, %v2143_v35  ;;  %2015 = vmatprep.subr.mxu1 %v2140_v1  ;;  %vm1090_vm15 = vcmp.eq.s32.totalorder %v2331_v52, 8 }
 0x30c   :  { %2046 = vmatprep.subr.mxu0 %v2140_v1  ;;  %2016 = vmatpush3.msk.msra.mxu1 %vm986_vm2, %v2143_v35  ;;  %vm1089_vm2 = vcmp.eq.s32.totalorder %v2337_v53, 8 }
 0x30d   :  { %2047 = vmatpush3.msk.msra.mxu0 %vm1096_vm3, %v2143_v35  ;;  %2017 = vmatprep.subr.mxu1 %v2140_v1  ;;  %vm1211_vm3 = vcmp.eq.s32.totalorder %v2460_v8, 9  ;;  %v1193_v8 = vrot.slane %v330_v32, %v1192_v4 }
 0x30e   :  { %2048 = vmatprep.subr.mxu0 %v2140_v1  ;;  %2018 = vmatpush3.msk.msra.mxu1 %vm985_vm5, %v2143_v35  ;;  %vm1210_vm5 = vcmp.eq.s32.totalorder %v2256_v29, 9  ;;  %v1304_v29 = vld [vmem:[%s2867_s5] sm:$0xff] }
 0x30f   :  { %2049 = vmatpush3.msk.msra.mxu0 %vm1095_vm6, %v2143_v35  ;;  %2019 = vmatprep.subr.mxu1 %v2140_v1  ;;  %vm1209_vm6 = vcmp.eq.s32.totalorder %v2259_v30, 9  ;;  %v436_v30 = vsub.s32 0, %v2247_v23 }
 0x310   :  { %2050 = vmatprep.subr.mxu0 %v2140_v1  ;;  %2020 = vmatpush3.msk.msra.mxu1 %vm984_vm4, %v2143_v35  ;;  %vm1208_vm4 = vcmp.eq.s32.totalorder %v2262_v31, 9  ;;  %v544_v31 = vsub.s32 1, %v2247_v23 }
 0x311   :  { %2051 = vmatpush3.msk.msra.mxu0 %vm1094_vm7, %v2143_v35  ;;  %2021 = vmatprep.subr.mxu1 %v2140_v1  ;;  %vm1306_vm7 = vcmask 31744   ;;  %v437_v34 = vrot.slane %v330_v32, %v436_v30  ;;  %v1383_v30 = vld [vmem:[%s2870_s8] sm:$0xff] }
 0x312   :  { %2052 = vmatprep.subr.mxu0 %v2140_v1  ;;  %2022 = vmatpush3.msk.msra.mxu1 %vm983_vm8, %v2143_v35  ;;  %vm1207_vm8 = vcmp.eq.s32.totalorder %v2268_v33, 9 }
 0x313   :  { %2053 = vmatpush3.msk.msra.mxu0 %vm1093_vm9, %v2143_v35  ;;  %2023 = vmatprep.subr.mxu1 %v2140_v1  ;;  %vm1206_vm9 = vcmp.eq.s32.totalorder %v2275_v36, 9  ;;  %v545_v36 = vrot.slane %v330_v32, %v544_v31 }
 0x314   :  { %2054 = vmatprep.subr.mxu0 %v2140_v1  ;;  %2024 = vmatpush3.msk.msra.mxu1 %vm982_vm10, %v2143_v35  ;;  %vm1204_vm10 = vcmp.eq.s32.totalorder %v2289_v40, 9 }
 0x315   :  { %2055 = vmatpush3.msk.msra.mxu0 %vm1092_vm11, %v2143_v35  ;;  %2025 = vmatprep.subr.mxu1 %v2140_v1  ;;  %vm1203_vm11 = vcmp.eq.s32.totalorder %v2296_v42, 9 }
 0x316   :  { %2056 = vmatprep.subr.mxu0 %v2140_v1  ;;  %2026 = vmatpush3.msk.msra.mxu1 %vm981_vm12, %v2143_v35  ;;  %vm1201_vm12 = vcmp.eq.s32.totalorder %v2310_v46, 9 }
 0x317   :  { %2057 = vmatpush3.msk.msra.mxu0 %vm1091_vm13, %v2143_v35  ;;  %2027 = vmatprep.subr.mxu1 %v2140_v1  ;;  %vm1200_vm13 = vcmp.eq.s32.totalorder %v2317_v48, 9 }
 0x318   :  { %2058 = vmatprep.subr.mxu0 %v2140_v1  ;;  %2028 = vmatpush3.msk.msra.mxu1 %vm980_vm14, %v2143_v35  ;;  %vm1199_vm14 = vcmp.eq.s32.totalorder %v2324_v50, 9 }
 0x319   :  { %2029 = vmatprep.mubr.msk.f32.mxu1 %vm2141_vm1, %v2140_v1  ;;  %2059 = vmatpush3.msk.msra.mxu0 %vm1090_vm15, %v2143_v35  ;;  %vm1198_vm15 = vcmp.eq.s32.totalorder %v2331_v52, 9 }
 0x31a   :  { %2030 = vmatmul.mubr.f32.vlgmr.msra.gmra.mxu1 %v2538_v21  ;;  %2060 = vmatprep.subr.mxu0 %v2140_v1 }
 0x31b   :  { %2067 = vmatprep.subr.mxu1 %v2140_v1  ;;  %2061 = vmatpush3.msk.msra.mxu0 %vm1089_vm2, %v2143_v35  ;;  %vm1197_vm2 = vcmp.eq.s32.totalorder %v2337_v53, 9  ;;  %v868_v53 = vsub.s32 4, %v2247_v23 }
 0x31c   :  { %2068 = vmatpush3.msk.msra.mxu1 %vm1211_vm3, %v2143_v35  ;;  %2062 = vmatprep.subr.mxu0 %v2140_v1 }
 0x31d   :  { %2069 = vmatprep.subr.mxu1 %v2140_v1  ;;  %2063 = vmatpush3.msra.mxu0 %v2140_v1  ;;  %v869_v54 = vrot.slane %v330_v32, %v868_v53 }
 0x31e   :  { %2064 = vmatprep.mubr.msk.f32.mxu0 %vm2141_vm1, %v2140_v1  ;;  %2070 = vmatpush3.msk.msra.mxu1 %vm1210_vm5, %v2143_v35 }
 0x31f   :  { %2065 = vmatmul.mubr.f32.vlgmr.msra.gmra.mxu0 %v2552_v24  ;;  %2071 = vmatprep.subr.mxu1 %v2140_v1 }
 0x320   :  { %2072 = vmatpush3.msk.msra.mxu1 %vm1209_vm6, %v2143_v35  ;;  %2102 = vmatprep.subr.mxu0 %v2140_v1 }
 0x321   :  { %2073 = vmatprep.subr.mxu1 %v2140_v1  ;;  %2103 = vmatpush3.msk.msra.mxu0 %vm46_vm0, %v1305_v28  ;;  %vm1205_vm0 = vcmp.eq.s32.totalorder %v2282_v38, 9 }
 0x322   :  { %2074 = vmatpush3.msk.msra.mxu1 %vm1208_vm4, %v2143_v35  ;;  %2104 = vmatprep.mubr.msk.f32.mxu0 %vm2141_vm1, %v2140_v1 }
 0x323   :  { %2075 = vmatprep.subr.mxu1 %v2140_v1  ;;  %2105 = vmatmul.mubr.msk.f32.vlgmr.msra.gmra.mxu0 %vm1306_vm7, %v1304_v29 }
 0x324   :  { %2076 = vmatpush3.msk.msra.mxu1 %vm1207_vm8, %v2143_v35  ;;  %2099 = vmatprep.mubr.msk.f32.mxu1 %vm2141_vm1, %v2140_v1  ;;  %vm1202_vm1 = vcmp.eq.s32.totalorder %v2303_v44, 9 }
 0x325   :  { %2077 = vmatprep.subr.mxu1 %v2140_v1 }
 0x326   :  { %2078 = vmatpush3.msk.msra.mxu1 %vm1206_vm9, %v2143_v35 }
 0x327   :  { %2079 = vmatprep.subr.mxu1 %v2140_v1 }
 0x328   :  { %2080 = vmatpush3.msk.msra.mxu1 %vm1205_vm0, %v2143_v35 }
 0x329   :  { %2081 = vmatprep.subr.mxu1 %v2140_v1 }
 0x32a   :  { %2082 = vmatpush3.msk.msra.mxu1 %vm1204_vm10, %v2143_v35 }
 0x32b   :  { %2083 = vmatprep.subr.mxu1 %v2140_v1 }
 0x32c   :  { %2084 = vmatpush3.msk.msra.mxu1 %vm1203_vm11, %v2143_v35 }
 0x32d   :  { %2085 = vmatprep.subr.mxu1 %v2140_v1 }
 0x32e   :  { %2086 = vmatpush3.msk.msra.mxu1 %vm1202_vm1, %v2143_v35 }
 0x32f   :  { %2087 = vmatprep.subr.mxu1 %v2140_v1 }
 0x330   :  { %2088 = vmatpush3.msk.msra.mxu1 %vm1201_vm12, %v2143_v35 }
 0x331   :  { %2089 = vmatprep.subr.mxu1 %v2140_v1 }
 0x332   :  { %2090 = vmatpush3.msk.msra.mxu1 %vm1200_vm13, %v2143_v35 }
 0x333   :  { %2091 = vmatprep.subr.mxu1 %v2140_v1 }
 0x334   :  { %2092 = vmatpush3.msk.msra.mxu1 %vm1199_vm14, %v2143_v35 }
 0x335   :  { %2093 = vmatprep.subr.mxu1 %v2140_v1 }
 0x336   :  { %2094 = vmatpush3.msk.msra.mxu1 %vm1198_vm15, %v2143_v35 }
 0x337   :  { %2095 = vmatprep.subr.mxu1 %v2140_v1 }
 0x338   :  { %2096 = vmatpush3.msk.msra.mxu1 %vm1197_vm2, %v2143_v35 }
 0x339   :  { %2097 = vmatprep.subr.mxu1 %v2140_v1 }
 0x33a   :  { %2098 = vmatpush3.msra.mxu1 %v2140_v1  ;;  %v652_v1 = vsub.s32 2, %v2247_v23  ;;  %v1577_v23 = vld [vmem:[%s2864_s2 + $0x8] ss:$0 sm:$0xff]  ;;  %s2144_s2 = smov [#allocation2]  }
 0x33b   :  { %2100 = vmatmul.mubr.f32.vlgmr.msra.gmra.mxu1 %v2566_v26  ;;  %s1418_s9 = sshll.u32 %s2144_s2, 4  ;;  %s1419_s9 = int_to_ptr.vmem [resolvable:$true] %s1418_s9 }
 0x33c   :  { %v653_v42 = vrot.slane %v330_v32, %v652_v1  ;;  %s2118_s28 = scalar_lea.vmem %s1419_s9, 128  ;;  %p2123_p1 = scmp.lt.s32.totalorder %s1419_s9, %s1419_s9 }
 0x33d   :  { %p2119_p0 = scmp.ne.s32.totalorder %s1419_s9, %s2118_s28  ;;  %p2124_p2 = scmp.lt.s32.totalorder %s2118_s28, %s2118_s28 }
 0x33f   :  { %p2125_p3 = por %p2124_p2, %p2123_p1 }
 0x341   :  { %p2126_p4 = pnand %p2125_p3, %p2119_p0 }
 0x376   :  { %v430_v33 = vpop.f32.mrf.mxu1 }
 0x377   :  { %v438_v35 = vmul.f32 %v437_v34, %v430_v33 }
 0x378   :  { %v1823_v37 = vpop.f32.mrf.mxu1 }
 0x37a   :  { %v538_v38 = vpop.f32.mrf.mxu0 }
 0x37b   :  { %v546_v39 = vmul.f32 %v545_v36, %v538_v38 }
 0x37c   :  { %v1856_v40 = vpop.f32.mrf.mxu0 }
 0x37d   :  { %v547_v41 = vadd.f32 %v546_v39, %v438_v35 }
 0x396   :  { %v646_v44 = vpop.f32.mrf.mxu1 }
 0x397   :  { %v654_v45 = vmul.f32 %v653_v42, %v646_v44 }
 0x398   :  { %v1891_v46 = vpop.f32.mrf.mxu1 }
 0x399   :  { %v655_v48 = vadd.f32 %v654_v45, %v547_v41 }
 0x39b   :  { %v754_v49 = vpop.f32.mrf.mxu0 }
 0x39c   :  { %v762_v50 = vmul.f32 %v761_v47, %v754_v49 }
 0x39d   :  { %v1926_v51 = vpop.f32.mrf.mxu0 }
 0x39e   :  { %v763_v52 = vadd.f32 %v762_v50, %v655_v48 }
 0x3b8   :  { %v862_v56 = vpop.f32.mrf.mxu1 }
 0x3b9   :  { %v870_v57 = vmul.f32 %v869_v54, %v862_v56 }
 0x3ba   :  { %v1961_v58 = vpop.f32.mrf.mxu1 }
 0x3bb   :  { %v871_v60 = vadd.f32 %v870_v57, %v763_v52 }
 0x3bd   :  { %v970_v61 = vpop.f32.mrf.mxu0 }
 0x3be   :  { %v978_v62 = vmul.f32 %v977_v59, %v970_v61 }
 0x3bf   :  { %v1996_v63 = vpop.f32.mrf.mxu0 }
 0x3c0   :  { %v979_v0 = vadd.f32 %v978_v62, %v871_v60 }
 0x3da   :  { %v1078_v5 = vpop.f32.mrf.mxu1 }
 0x3db   :  { %v1086_v6 = vmul.f32 %v1085_v3, %v1078_v5 }
 0x3dc   :  { %v2031_v7 = vpop.f32.mrf.mxu1 }
 0x3dd   :  { %v1087_v9 = vadd.f32 %v1086_v6, %v979_v0 }
 0x3df   :  { %v1186_v10 = vpop.f32.mrf.mxu0 }
 0x3e0   :  { %v1194_v11 = vmul.f32 %v1193_v8, %v1186_v10 }
 0x3e1   :  { %v2066_v12 = vpop.f32.mrf.mxu0 }
 0x3e2   :  { %v1195_v13 = vadd.f32 %v1194_v11, %v1087_v9 }
 0x3e3   :  { %v1379_v14 = vpop.f32.mrf.mxu0 }
 0x3e4   :  { %1385 = vadd.xlane.f32.xlu0 %v1379_v14  ;;  %v1388_v15 = vmul.f32 %v1379_v14, %v1379_v14 }
 0x3e5   :  { %v2106_v16 = vpop.f32.mrf.mxu0 }
 0x3e6   :  { %1389 = vadd.xlane.f32.xlu1 %v1388_v15 }
 0x3f7   :  { %1406 = vperm.xlu1 %2112, %v1384_v17  }
 0x3fb   :  { %v1294_v18 = vpop.f32.mrf.mxu1 }
 0x3fc   :  { %v1302_v19 = vmul.f32 %v1577_v23, %v1294_v18 }
 0x3fd   :  { %v2101_v20 = vpop.f32.mrf.mxu1 }
 0x3fe   :  { %v1303_v21 = vadd.f32 %v1302_v19, %v1195_v13 }
 0x46d   :  { %v1386_v22 = vpop.xlane.xlu0 %1385 }
 0x46e   :  { %v1387_v24 = vmul.f32 0.0078125, %v1386_v22 }
 0x46f   :  { %v1390_v25 = vpop.xlane.xlu1 %1389 }
 0x470   :  { %v1392_v26 = vmul.f32 %v1387_v24, %v1387_v24  ;;  %v1391_v27 = vmul.f32 0.0078125, %v1390_v25  ;;  %v1397_v33 = vsub.f32 %v1379_v14, %v1387_v24 }
 0x472   :  { %v1393_v28 = vsub.f32 %v1391_v27, %v1392_v26 }
 0x473   :  { %v1407_v37 = vpop.permute.xlu1 %1406 }
 0x474   :  { %v1394_v29 = vadd.f32 1e-05, %v1393_v28 }
 0x476   :  { %2116 = vrsqrt.f32 %v1394_v29 }
 0x483   :  { %v2117_v31 = vpop.eup %2116 }
 0x484   :  { %v1396_v32 = vmul.f32 %v2117_v31, %v1383_v30 }
 0x486   :  { %1400 = vperm.xlu0 %2113, %v1396_v32  }
 0x501   :  { %v1401_v34 = vpop.permute.xlu0 %1400 }
 0x502   :  { %v1403_v36 = vmul.f32 %v1401_v34, %v1397_v33 }
 0x504   :  { %v1409_v38 = vadd.f32 %v1407_v37, %v1403_v36 }
 0x506   :  { %v1410_v35 = vadd.f32 %v1409_v38, %v1303_v21 }
 0x508   :  { %1411 = vst [vmem:[#allocation2] sm:$0xff] %v1410_v35 }
 0x509   :  { %2129 = shalt.err (!%p2126_p4)
}
 0x50a   :  { %1421 = dma.vmem_to_hbm [thread:$0]  %s1419_s9, 128, %s2872_s10, [#allocation3]  }
 0x50b   :  { %2138 = dma.done.wait [#allocation3], 128  }
 0x50c   :  { %2139 = vsyncadd [#allocation3], 4294967168 }
 0x50d   :  { %1425 = vsyncpa [#allocation3], 1 }

</bundles_post_ra>
